<compile_context>
chip_gen: v7x
topology: tpu7x:2x2x1
jax: 0.10.0
libtpu: 0.0.40
codegen_flags: <defaults>
</compile_context>

<pallas_src>
import functools

import jax
import jax.numpy as jnp
import numpy as np
from jax.experimental import pallas as pl
from jax.experimental.pallas import tpu as pltpu


# ----------------------------- in-kernel helpers -----------------------------

def _erf(x):
    # Abramowitz & Stegun 7.1.26 rational approximation (max abs err ~1.5e-7).
    # Uses only exp -> Mosaic friendly; kept in f32 (v5e has no bf16 VPU/EUP).
    p = 0.3275911
    a1, a2, a3, a4, a5 = (0.254829592, -0.284496736, 1.421413741,
                          -1.453152027, 1.061405429)
    ax = jnp.abs(x)
    t = 1.0 / (1.0 + p * ax)
    poly = ((((a5 * t + a4) * t + a3) * t + a2) * t + a1) * t
    y = 1.0 - poly * jnp.exp(-ax * ax)
    return jnp.where(x >= 0.0, y, -y)


def _gelu(x):
    # exact (erf-based) GELU, matching torch.nn.GELU() default
    return 0.5 * x * (1.0 + _erf(x * 0.7071067811865476))


def _layernorm(x, g, b, eps=1e-5):
    mu = jnp.mean(x, axis=-1, keepdims=True)
    var = jnp.mean((x - mu) ** 2, axis=-1, keepdims=True)
    return (x - mu) * jax.lax.rsqrt(var + eps) * g + b


# --------------------------------- kernel ------------------------------------

def mhsa_block_kernel(x_ref, ln1g_ref, ln1b_ref, wqkv_ref, bqkv_ref,
                      wproj_ref, bproj_ref, ln2g_ref, ln2b_ref,
                      w1_ref, b1_ref, w2_ref, b2_ref, o_ref,
                      *, num_heads, top_m):
    x = x_ref[0]                                   # (N, C)
    H = num_heads

    # ---- attention branch: x + attn(norm1(x)) ----
    xn = _layernorm(x, ln1g_ref[...], ln1b_ref[...])

    # QKV for all heads in one batched matmul.  wqkv_ref is (3H, C, hd) with
    # the attention scale already folded into the Q heads (indices 0..H-1).
    xb = jnp.broadcast_to(xn, (3 * H,) + xn.shape)                 # (3H, N, C)
    qkv = jnp.einsum('knc,kcd->knd', xb, wqkv_ref[...],
                     preferred_element_type=jnp.float32) + bqkv_ref[...]
    q = qkv[:H]            # (H, N, hd) — leading-axis slices, no lane movement
    k = qkv[H:2 * H]
    v = qkv[2 * H:]

    # scores for all heads at once: (H, N, N)
    scores = jnp.einsum('hnd,hmd->hnm', q, k,
                        preferred_element_type=jnp.float32)

    # top-m per row (top_m small & static).  The first iteration's max IS the
    # softmax row max, so it is computed once and reused below.
    neg_inf = -jnp.inf
    rowmax = jnp.max(scores, axis=-1, keepdims=True)
    thr = rowmax
    work = jnp.where(scores >= thr, neg_inf, scores)
    for _ in range(top_m - 1):
        thr = jnp.max(work, axis=-1, keepdims=True)
        work = jnp.where(work >= thr, neg_inf, work)
    kept = scores >= thr            # keeps entries >= m-th largest (ties keep extra)

    # masked softmax (attn dropout is identity in eval mode); reciprocal on EUP.
    p = jnp.where(kept, jnp.exp(scores - rowmax), 0.0)
    denom = jnp.sum(p, axis=-1, keepdims=True)
    p = p * pl.reciprocal(denom, approx=True)

    pv = jnp.einsum('hnm,hmd->hnd', p, v,
                    preferred_element_type=jnp.float32)            # (H, N, hd)

    # head-recombining output projection: batched per-head (hd, C) matmul and a
    # major-axis sum — replaces transpose+concat+single (C, C) matmul.
    proj_h = jnp.einsum('hnd,hdc->hnc', pv, wproj_ref[...],
                        preferred_element_type=jnp.float32)        # (H, N, C)
    attn_out = jnp.sum(proj_h, axis=0) + bproj_ref[...]
    x1 = x + attn_out                              # DropPath = identity (eval)

    # ---- MLP branch: x1 + mlp(norm2(x1)) ----
    xn2 = _layernorm(x1, ln2g_ref[...], ln2b_ref[...])
    h1 = _gelu(jnp.dot(xn2, w1_ref[...],
                       preferred_element_type=jnp.float32) + b1_ref[...])
    h2 = jnp.dot(h1, w2_ref[...],
                 preferred_element_type=jnp.float32) + b2_ref[...]
    o_ref[0] = x1 + h2


# ------------------------- one-time parameter repacking -----------------------

def prepare_params(params, *, num_heads):
    """Repack torch-layout params into the kernel layout (done once, off-kernel).

    - w_qkv (C, 3C) / b_qkv (1, 3C)  ->  (3H, C, hd) / (3H, 1, hd), with the
      attention scale folded into the Q heads.
    - w_proj (C, C)                   ->  (H, hd, C).
    """
    C = params["w_qkv"].shape[0]
    H = num_heads
    hd = C // H
    scale = hd ** (-0.5)

    w_qkv = params["w_qkv"]                     # columns = [q | k | v], heads contiguous
    b_qkv = params["b_qkv"].reshape(3 * C)

    def split(w_cols, b_cols, s):
        w = w_cols.reshape(C, H, hd).transpose(1, 0, 2) * s      # (H, C, hd)
        b = b_cols.reshape(H, 1, hd) * s                         # (H, 1, hd)
        return w, b

    wq, bq = split(w_qkv[:, :C], b_qkv[:C], scale)               # scale folded into Q
    wk, bk = split(w_qkv[:, C:2 * C], b_qkv[C:2 * C], 1.0)
    wv, bv = split(w_qkv[:, 2 * C:], b_qkv[2 * C:], 1.0)

    return dict(
        params,
        w_qkv_h=jnp.concatenate([wq, wk, wv], axis=0),           # (3H, C, hd)
        b_qkv_h=jnp.concatenate([bq, bk, bv], axis=0),           # (3H, 1, hd)
        w_proj_h=params["w_proj"].reshape(H, hd, C),             # (H, hd, C)
    )


# --------------------------------- wrapper -----------------------------------

def mhsa_block(x, prepped, *, num_heads, top_m):
    B, N, C = x.shape
    H = num_heads
    hd = C // H
    F = prepped["w1"].shape[1]

    kern = functools.partial(mhsa_block_kernel, num_heads=H, top_m=top_m)

    def full(shape):
        # grid-invariant (constant index map) weight / bias block
        return pl.BlockSpec(shape, lambda b, _n=len(shape): (0,) * _n)

    grid_spec = pltpu.PrefetchScalarGridSpec(
        num_scalar_prefetch=0,
        grid=(B,),
        in_specs=[
            pl.BlockSpec((1, N, C), lambda b: (b, 0, 0)),        # x
            full((1, C)), full((1, C)),                          # ln1 gamma / beta
            full((3 * H, C, hd)), full((3 * H, 1, hd)),          # per-head qkv W / b
            full((H, hd, C)), full((1, C)),                      # per-head proj W / b
            full((1, C)), full((1, C)),                          # ln2 gamma / beta
            full((C, F)), full((1, F)),                          # mlp fc1 W / b
            full((F, C)), full((1, C)),                          # mlp fc2 W / b
        ],
        out_specs=pl.BlockSpec((1, N, C), lambda b: (b, 0, 0)),
    )

    return pl.pallas_call(
        kern,
        out_shape=jax.ShapeDtypeStruct((B, N, C), jnp.float32),
        grid_spec=grid_spec,
        compiler_params=pltpu.CompilerParams(
            dimension_semantics=("parallel",)),
    )(x, prepped["ln1_g"], prepped["ln1_b"],
      prepped["w_qkv_h"], prepped["b_qkv_h"],
      prepped["w_proj_h"], prepped["b_proj"],
      prepped["ln2_g"], prepped["ln2_b"],
      prepped["w1"], prepped["b1"], prepped["w2"], prepped["b2"])


# ------------------------------ pure-JAX reference ----------------------------

def mhsa_block_ref(x, params, *, num_heads, top_m):
    B, N, C = x.shape
    hd = C // num_heads
    scale = hd ** (-0.5)

    def ln(z, g, b):
        mu = z.mean(-1, keepdims=True)
        var = ((z - mu) ** 2).mean(-1, keepdims=True)
        return (z - mu) / jnp.sqrt(var + 1e-5) * g + b

    xn = ln(x, params["ln1_g"], params["ln1_b"])
    qkv = xn @ params["w_qkv"] + params["b_qkv"]
    qkv = qkv.reshape(B, N, 3, num_heads, hd).transpose(2, 0, 3, 1, 4)
    q, k, v = qkv[0], qkv[1], qkv[2]                       # (B, H, N, hd)
    attn = jnp.einsum("bhnd,bhmd->bhnm", q, k) * scale
    thr = jax.lax.top_k(attn, top_m)[0][..., -1:]
    attn = jnp.where(attn >= thr, attn, -jnp.inf)
    attn = jax.nn.softmax(attn, axis=-1)
    out = jnp.einsum("bhnm,bhmd->bhnd", attn, v)
    out = out.transpose(0, 2, 1, 3).reshape(B, N, C)
    out = out @ params["w_proj"] + params["b_proj"]
    x = x + out
    xn2 = ln(x, params["ln2_g"], params["ln2_b"])
    h = jax.nn.gelu(xn2 @ params["w1"] + params["b1"], approximate=False)
    h = h @ params["w2"] + params["b2"]
    return x + h


# ----------------------------------- main -------------------------------------

if __name__ == "__main__":
    # embed_dim=32, nhead=4, dim_feedforward=64, top_m=4; B=2 sequences of N=8.
    B, N, C, H, F, TOP_M = 2, 8, 32, 4, 64, 4

    key = jax.random.PRNGKey(0)
    ks = jax.random.split(key, 5)

    def trunc(k, shape):
        # deterministic trunc_normal(std=0.02)-style init
        return (0.02 * jax.random.truncated_normal(k, -2.0, 2.0, shape)
                ).astype(jnp.float32)

    params = {
        "ln1_g": jnp.ones((1, C), jnp.float32),
        "ln1_b": jnp.zeros((1, C), jnp.float32),
        "w_qkv": trunc(ks[0], (C, 3 * C)),
        "b_qkv": jnp.zeros((1, 3 * C), jnp.float32),
        "w_proj": trunc(ks[1], (C, C)),
        "b_proj": jnp.zeros((1, C), jnp.float32),
        "ln2_g": jnp.ones((1, C), jnp.float32),
        "ln2_b": jnp.zeros((1, C), jnp.float32),
        "w1": trunc(ks[2], (C, F)),
        "b1": jnp.zeros((1, F), jnp.float32),
        "w2": trunc(ks[3], (F, C)),
        "b2": jnp.zeros((1, C), jnp.float32),
    }
    x = jax.random.normal(ks[4], (B, N, C), jnp.float32)

    prepped = prepare_params(params, num_heads=H)
    out = mhsa_block(x, prepped, num_heads=H, top_m=TOP_M)
    jax.block_until_ready(out)

    ref = mhsa_block_ref(x, params, num_heads=H, top_m=TOP_M)
    # Tolerance slightly looser than rev 1: pl.reciprocal(approx=True) in the
    # softmax denominator is an EUP approximation of the exact divide used by
    # the pure-JAX reference.
    np.testing.assert_allclose(np.asarray(out), np.asarray(ref),
                               rtol=2e-3, atol=1e-4)
    print("KERNEL_OK")
</pallas_src>

<mosaic_0001>
module attributes {stable_mosaic.version = 11 : i64} {
  func.func @mhsa_block_kernel(%arg0: i32, %arg1: memref<1x8x32xf32, #tpu.memory_space<vmem>>, %arg2: memref<1x32xf32, #tpu.memory_space<vmem>>, %arg3: memref<1x32xf32, #tpu.memory_space<vmem>>, %arg4: memref<12x32x8xf32, #tpu.memory_space<vmem>>, %arg5: memref<12x1x8xf32, #tpu.memory_space<vmem>>, %arg6: memref<4x8x32xf32, #tpu.memory_space<vmem>>, %arg7: memref<1x32xf32, #tpu.memory_space<vmem>>, %arg8: memref<1x32xf32, #tpu.memory_space<vmem>>, %arg9: memref<1x32xf32, #tpu.memory_space<vmem>>, %arg10: memref<32x64xf32, #tpu.memory_space<vmem>>, %arg11: memref<1x64xf32, #tpu.memory_space<vmem>>, %arg12: memref<64x32xf32, #tpu.memory_space<vmem>>, %arg13: memref<1x32xf32, #tpu.memory_space<vmem>>, %arg14: memref<1x8x32xf32, #tpu.memory_space<vmem>>) attributes {dimension_semantics = [#tpu.dimension_semantics<parallel>], iteration_bounds = array<i64: 2>, scalar_prefetch = 0 : i64, scratch_operands = 0 : i64, tpu.core_type = #tpu.core_type<tc>, window_params = [{transform_indices = @transform_0, window_bounds = array<i64: 1, 8, 32>}, {pipeline_mode = #tpu.pipeline_mode<synchronous>, transform_indices = @transform_1, window_bounds = array<i64: 1, 32>}, {pipeline_mode = #tpu.pipeline_mode<synchronous>, transform_indices = @transform_2, window_bounds = array<i64: 1, 32>}, {pipeline_mode = #tpu.pipeline_mode<synchronous>, transform_indices = @transform_3, window_bounds = array<i64: 12, 32, 8>}, {pipeline_mode = #tpu.pipeline_mode<synchronous>, transform_indices = @transform_4, window_bounds = array<i64: 12, 1, 8>}, {pipeline_mode = #tpu.pipeline_mode<synchronous>, transform_indices = @transform_5, window_bounds = array<i64: 4, 8, 32>}, {pipeline_mode = #tpu.pipeline_mode<synchronous>, transform_indices = @transform_6, window_bounds = array<i64: 1, 32>}, {pipeline_mode = #tpu.pipeline_mode<synchronous>, transform_indices = @transform_7, window_bounds = array<i64: 1, 32>}, {pipeline_mode = #tpu.pipeline_mode<synchronous>, transform_indices = @transform_8, window_bounds = array<i64: 1, 32>}, {pipeline_mode = #tpu.pipeline_mode<synchronous>, transform_indices = @transform_9, window_bounds = array<i64: 32, 64>}, {pipeline_mode = #tpu.pipeline_mode<synchronous>, transform_indices = @transform_10, window_bounds = array<i64: 1, 64>}, {pipeline_mode = #tpu.pipeline_mode<synchronous>, transform_indices = @transform_11, window_bounds = array<i64: 64, 32>}, {pipeline_mode = #tpu.pipeline_mode<synchronous>, transform_indices = @transform_12, window_bounds = array<i64: 1, 32>}, {transform_indices = @transform_13, window_bounds = array<i64: 1, 8, 32>}]} {
    %c0 = arith.constant 0 : index
    %c0_0 = arith.constant 0 : index
    %c0_1 = arith.constant 0 : index
    %0 = vector.load %arg1[%c0, %c0_0, %c0_1] : memref<1x8x32xf32, #tpu.memory_space<vmem>>, vector<1x8x32xf32>
    %1 = vector.shape_cast %0 : vector<1x8x32xf32> to vector<8x32xf32>
    %c0_2 = arith.constant 0 : index
    %c0_3 = arith.constant 0 : index
    %2 = vector.load %arg2[%c0_2, %c0_3] : memref<1x32xf32, #tpu.memory_space<vmem>>, vector<1x32xf32>
    %c0_4 = arith.constant 0 : index
    %c0_5 = arith.constant 0 : index
    %3 = vector.load %arg3[%c0_4, %c0_5] : memref<1x32xf32, #tpu.memory_space<vmem>>, vector<1x32xf32>
    %cst = arith.constant dense<0.000000e+00> : vector<8xf32>
    %4 = vector.multi_reduction <add>, %1, %cst [1] : vector<8x32xf32> to vector<8xf32>
    %5 = vector.shape_cast %4 : vector<8xf32> to vector<8x1xf32>
    %cst_6 = arith.constant 3.200000e+01 : f32
    %6 = vector.broadcast %cst_6 : f32 to vector<8x1xf32>
    %7 = arith.divf %5, %6 : vector<8x1xf32>
    %8 = vector.broadcast %7 : vector<8x1xf32> to vector<8x32xf32>
    %9 = arith.subf %1, %8 : vector<8x32xf32>
    %10 = arith.mulf %9, %9 : vector<8x32xf32>
    %cst_7 = arith.constant dense<0.000000e+00> : vector<8xf32>
    %11 = vector.multi_reduction <add>, %10, %cst_7 [1] : vector<8x32xf32> to vector<8xf32>
    %12 = vector.shape_cast %11 : vector<8xf32> to vector<8x1xf32>
    %cst_8 = arith.constant 3.200000e+01 : f32
    %13 = vector.broadcast %cst_8 : f32 to vector<8x1xf32>
    %14 = arith.divf %12, %13 : vector<8x1xf32>
    %15 = vector.broadcast %7 : vector<8x1xf32> to vector<8x32xf32>
    %16 = arith.subf %1, %15 : vector<8x32xf32>
    %cst_9 = arith.constant 9.99999974E-6 : f32
    %17 = vector.broadcast %cst_9 : f32 to vector<8x1xf32>
    %18 = arith.addf %14, %17 : vector<8x1xf32>
    %19 = math.rsqrt %18 : vector<8x1xf32>
    %20 = vector.broadcast %19 : vector<8x1xf32> to vector<8x32xf32>
    %21 = arith.mulf %16, %20 : vector<8x32xf32>
    %22 = vector.broadcast %2 : vector<1x32xf32> to vector<8x32xf32>
    %23 = arith.mulf %21, %22 : vector<8x32xf32>
    %24 = vector.broadcast %3 : vector<1x32xf32> to vector<8x32xf32>
    %25 = arith.addf %23, %24 : vector<8x32xf32>
    %26 = vector.shape_cast %25 : vector<8x32xf32> to vector<1x8x32xf32>
    %27 = vector.broadcast %26 : vector<1x8x32xf32> to vector<12x8x32xf32>
    %c0_10 = arith.constant 0 : index
    %c0_11 = arith.constant 0 : index
    %c0_12 = arith.constant 0 : index
    %28 = vector.load %arg4[%c0_10, %c0_11, %c0_12] : memref<12x32x8xf32, #tpu.memory_space<vmem>>, vector<12x32x8xf32>
    "tpu.trace_start"() <{level = 10 : i32, message = "knc,kcd->knd"}> : () -> ()
    %cst_13 = arith.constant dense<0.000000e+00> : vector<12x8x8xf32>
    %29 = tpu.matmul %27, %28, %cst_13 {dimension_numbers = #tpu.dot_dimension_numbers<[2], [1], [1], [2], [0, 0, 0, 1, 1, 2], [0], [0]>} : vector<12x8x32xf32>, vector<12x32x8xf32>, vector<12x8x8xf32> -> vector<12x8x8xf32>
    "tpu.trace_stop"() : () -> ()
    %c0_14 = arith.constant 0 : index
    %c0_15 = arith.constant 0 : index
    %c0_16 = arith.constant 0 : index
    %30 = vector.load %arg5[%c0_14, %c0_15, %c0_16] : memref<12x1x8xf32, #tpu.memory_space<vmem>>, vector<12x1x8xf32>
    %31 = vector.broadcast %30 : vector<12x1x8xf32> to vector<12x8x8xf32>
    %32 = arith.addf %29, %31 : vector<12x8x8xf32>
    %33 = vector.extract_strided_slice %32 {offsets = [0, 0, 0], sizes = [4, 8, 8], strides = [1, 1, 1]} : vector<12x8x8xf32> to vector<4x8x8xf32>
    %34 = vector.extract_strided_slice %32 {offsets = [4, 0, 0], sizes = [4, 8, 8], strides = [1, 1, 1]} : vector<12x8x8xf32> to vector<4x8x8xf32>
    %35 = vector.extract_strided_slice %32 {offsets = [8, 0, 0], sizes = [4, 8, 8], strides = [1, 1, 1]} : vector<12x8x8xf32> to vector<4x8x8xf32>
    "tpu.trace_start"() <{level = 10 : i32, message = "hnd,hmd->hnm"}> : () -> ()
    %cst_17 = arith.constant dense<0.000000e+00> : vector<4x8x8xf32>
    %36 = tpu.matmul %33, %34, %cst_17 {dimension_numbers = #tpu.dot_dimension_numbers<[2], [2], [1], [1], [0, 0, 0, 1, 1, 1], [0], [0]>} : vector<4x8x8xf32>, vector<4x8x8xf32>, vector<4x8x8xf32> -> vector<4x8x8xf32>
    "tpu.trace_stop"() : () -> ()
    %cst_18 = arith.constant dense<0xFF800000> : vector<4x8xf32>
    %37 = vector.multi_reduction <maximumf>, %36, %cst_18 [2] : vector<4x8x8xf32> to vector<4x8xf32>
    %38 = vector.shape_cast %37 : vector<4x8xf32> to vector<4x8x1xf32>
    %39 = vector.broadcast %38 : vector<4x8x1xf32> to vector<4x8x8xf32>
    %40 = arith.cmpf oge, %36, %39 : vector<4x8x8xf32>
    %cst_19 = arith.constant 0xFF800000 : f32
    %41 = vector.broadcast %cst_19 : f32 to vector<4x8x8xf32>
    %42 = arith.select %40, %41, %36 : vector<4x8x8xi1>, vector<4x8x8xf32>
    %cst_20 = arith.constant dense<0xFF800000> : vector<4x8xf32>
    %43 = vector.multi_reduction <maximumf>, %42, %cst_20 [2] : vector<4x8x8xf32> to vector<4x8xf32>
    %44 = vector.shape_cast %43 : vector<4x8xf32> to vector<4x8x1xf32>
    %45 = vector.broadcast %44 : vector<4x8x1xf32> to vector<4x8x8xf32>
    %46 = arith.cmpf oge, %42, %45 : vector<4x8x8xf32>
    %cst_21 = arith.constant 0xFF800000 : f32
    %47 = vector.broadcast %cst_21 : f32 to vector<4x8x8xf32>
    %48 = arith.select %46, %47, %42 : vector<4x8x8xi1>, vector<4x8x8xf32>
    %cst_22 = arith.constant dense<0xFF800000> : vector<4x8xf32>
    %49 = vector.multi_reduction <maximumf>, %48, %cst_22 [2] : vector<4x8x8xf32> to vector<4x8xf32>
    %50 = vector.shape_cast %49 : vector<4x8xf32> to vector<4x8x1xf32>
    %51 = vector.broadcast %50 : vector<4x8x1xf32> to vector<4x8x8xf32>
    %52 = arith.cmpf oge, %48, %51 : vector<4x8x8xf32>
    %cst_23 = arith.constant 0xFF800000 : f32
    %53 = vector.broadcast %cst_23 : f32 to vector<4x8x8xf32>
    %54 = arith.select %52, %53, %48 : vector<4x8x8xi1>, vector<4x8x8xf32>
    %cst_24 = arith.constant dense<0xFF800000> : vector<4x8xf32>
    %55 = vector.multi_reduction <maximumf>, %54, %cst_24 [2] : vector<4x8x8xf32> to vector<4x8xf32>
    %56 = vector.shape_cast %55 : vector<4x8xf32> to vector<4x8x1xf32>
    %57 = vector.broadcast %56 : vector<4x8x1xf32> to vector<4x8x8xf32>
    %58 = arith.cmpf oge, %36, %57 : vector<4x8x8xf32>
    %59 = vector.broadcast %38 : vector<4x8x1xf32> to vector<4x8x8xf32>
    %60 = arith.subf %36, %59 : vector<4x8x8xf32>
    %61 = math.exp %60 : vector<4x8x8xf32>
    %cst_25 = arith.constant 0.000000e+00 : f32
    %62 = vector.broadcast %cst_25 : f32 to vector<4x8x8xf32>
    %63 = arith.select %58, %61, %62 : vector<4x8x8xi1>, vector<4x8x8xf32>
    %cst_26 = arith.constant dense<0.000000e+00> : vector<4x8xf32>
    %64 = vector.multi_reduction <add>, %63, %cst_26 [2] : vector<4x8x8xf32> to vector<4x8xf32>
    %65 = vector.shape_cast %64 : vector<4x8xf32> to vector<4x8x1xf32>
    %66 = tpu.reciprocal %65 {approx = true} : vector<4x8x1xf32> -> vector<4x8x1xf32>
    %67 = vector.broadcast %66 : vector<4x8x1xf32> to vector<4x8x8xf32>
    %68 = arith.mulf %63, %67 : vector<4x8x8xf32>
    "tpu.trace_start"() <{level = 10 : i32, message = "hnm,hmd->hnd"}> : () -> ()
    %cst_27 = arith.constant dense<0.000000e+00> : vector<4x8x8xf32>
    %69 = tpu.matmul %68, %35, %cst_27 {dimension_numbers = #tpu.dot_dimension_numbers<[2], [1], [1], [2], [0, 0, 0, 1, 1, 2], [0], [0]>} : vector<4x8x8xf32>, vector<4x8x8xf32>, vector<4x8x8xf32> -> vector<4x8x8xf32>
    "tpu.trace_stop"() : () -> ()
    %c0_28 = arith.constant 0 : index
    %c0_29 = arith.constant 0 : index
    %c0_30 = arith.constant 0 : index
    %70 = vector.load %arg6[%c0_28, %c0_29, %c0_30] : memref<4x8x32xf32, #tpu.memory_space<vmem>>, vector<4x8x32xf32>
    "tpu.trace_start"() <{level = 10 : i32, message = "hnd,hdc->hnc"}> : () -> ()
    %cst_31 = arith.constant dense<0.000000e+00> : vector<4x8x32xf32>
    %71 = tpu.matmul %69, %70, %cst_31 {dimension_numbers = #tpu.dot_dimension_numbers<[2], [1], [1], [2], [0, 0, 0, 1, 1, 2], [0], [0]>} : vector<4x8x8xf32>, vector<4x8x32xf32>, vector<4x8x32xf32> -> vector<4x8x32xf32>
    "tpu.trace_stop"() : () -> ()
    %cst_32 = arith.constant dense<0.000000e+00> : vector<8x32xf32>
    %72 = vector.multi_reduction <add>, %71, %cst_32 [0] : vector<4x8x32xf32> to vector<8x32xf32>
    %c0_33 = arith.constant 0 : index
    %c0_34 = arith.constant 0 : index
    %73 = vector.load %arg7[%c0_33, %c0_34] : memref<1x32xf32, #tpu.memory_space<vmem>>, vector<1x32xf32>
    %74 = vector.broadcast %73 : vector<1x32xf32> to vector<8x32xf32>
    %75 = arith.addf %72, %74 : vector<8x32xf32>
    %76 = arith.addf %1, %75 : vector<8x32xf32>
    %c0_35 = arith.constant 0 : index
    %c0_36 = arith.constant 0 : index
    %77 = vector.load %arg8[%c0_35, %c0_36] : memref<1x32xf32, #tpu.memory_space<vmem>>, vector<1x32xf32>
    %c0_37 = arith.constant 0 : index
    %c0_38 = arith.constant 0 : index
    %78 = vector.load %arg9[%c0_37, %c0_38] : memref<1x32xf32, #tpu.memory_space<vmem>>, vector<1x32xf32>
    %cst_39 = arith.constant dense<0.000000e+00> : vector<8xf32>
    %79 = vector.multi_reduction <add>, %76, %cst_39 [1] : vector<8x32xf32> to vector<8xf32>
    %80 = vector.shape_cast %79 : vector<8xf32> to vector<8x1xf32>
    %cst_40 = arith.constant 3.200000e+01 : f32
    %81 = vector.broadcast %cst_40 : f32 to vector<8x1xf32>
    %82 = arith.divf %80, %81 : vector<8x1xf32>
    %83 = vector.broadcast %82 : vector<8x1xf32> to vector<8x32xf32>
    %84 = arith.subf %76, %83 : vector<8x32xf32>
    %85 = arith.mulf %84, %84 : vector<8x32xf32>
    %cst_41 = arith.constant dense<0.000000e+00> : vector<8xf32>
    %86 = vector.multi_reduction <add>, %85, %cst_41 [1] : vector<8x32xf32> to vector<8xf32>
    %87 = vector.shape_cast %86 : vector<8xf32> to vector<8x1xf32>
    %cst_42 = arith.constant 3.200000e+01 : f32
    %88 = vector.broadcast %cst_42 : f32 to vector<8x1xf32>
    %89 = arith.divf %87, %88 : vector<8x1xf32>
    %90 = vector.broadcast %82 : vector<8x1xf32> to vector<8x32xf32>
    %91 = arith.subf %76, %90 : vector<8x32xf32>
    %cst_43 = arith.constant 9.99999974E-6 : f32
    %92 = vector.broadcast %cst_43 : f32 to vector<8x1xf32>
    %93 = arith.addf %89, %92 : vector<8x1xf32>
    %94 = math.rsqrt %93 : vector<8x1xf32>
    %95 = vector.broadcast %94 : vector<8x1xf32> to vector<8x32xf32>
    %96 = arith.mulf %91, %95 : vector<8x32xf32>
    %97 = vector.broadcast %77 : vector<1x32xf32> to vector<8x32xf32>
    %98 = arith.mulf %96, %97 : vector<8x32xf32>
    %99 = vector.broadcast %78 : vector<1x32xf32> to vector<8x32xf32>
    %100 = arith.addf %98, %99 : vector<8x32xf32>
    %c0_44 = arith.constant 0 : index
    %c0_45 = arith.constant 0 : index
    %101 = vector.load %arg10[%c0_44, %c0_45] : memref<32x64xf32, #tpu.memory_space<vmem>>, vector<32x64xf32>
    %cst_46 = arith.constant dense<0.000000e+00> : vector<8x64xf32>
    %102 = tpu.matmul %100, %101, %cst_46 {dimension_numbers = #tpu.dot_dimension_numbers<[1], [0], [0], [1], [0, 0, 1, 1], [], []>} : vector<8x32xf32>, vector<32x64xf32>, vector<8x64xf32> -> vector<8x64xf32>
    %c0_47 = arith.constant 0 : index
    %c0_48 = arith.constant 0 : index
    %103 = vector.load %arg11[%c0_47, %c0_48] : memref<1x64xf32, #tpu.memory_space<vmem>>, vector<1x64xf32>
    %104 = vector.broadcast %103 : vector<1x64xf32> to vector<8x64xf32>
    %105 = arith.addf %102, %104 : vector<8x64xf32>
    %cst_49 = arith.constant 5.000000e-01 : f32
    %106 = vector.broadcast %cst_49 : f32 to vector<8x64xf32>
    %107 = arith.mulf %106, %105 : vector<8x64xf32>
    %cst_50 = arith.constant 0.707106769 : f32
    %108 = vector.broadcast %cst_50 : f32 to vector<8x64xf32>
    %109 = arith.mulf %105, %108 : vector<8x64xf32>
    %110 = math.absf %109 : vector<8x64xf32>
    %cst_51 = arith.constant 0.327591091 : f32
    %111 = vector.broadcast %cst_51 : f32 to vector<8x64xf32>
    %112 = arith.mulf %111, %110 : vector<8x64xf32>
    %cst_52 = arith.constant 1.000000e+00 : f32
    %113 = vector.broadcast %cst_52 : f32 to vector<8x64xf32>
    %114 = arith.addf %113, %112 : vector<8x64xf32>
    %cst_53 = arith.constant 1.000000e+00 : f32
    %115 = vector.broadcast %cst_53 : f32 to vector<8x64xf32>
    %116 = arith.divf %115, %114 : vector<8x64xf32>
    %cst_54 = arith.constant 1.06140542 : f32
    %117 = vector.broadcast %cst_54 : f32 to vector<8x64xf32>
    %118 = arith.mulf %117, %116 : vector<8x64xf32>
    %cst_55 = arith.constant -1.45315206 : f32
    %119 = vector.broadcast %cst_55 : f32 to vector<8x64xf32>
    %120 = arith.addf %118, %119 : vector<8x64xf32>
    %121 = arith.mulf %120, %116 : vector<8x64xf32>
    %cst_56 = arith.constant 1.42141378 : f32
    %122 = vector.broadcast %cst_56 : f32 to vector<8x64xf32>
    %123 = arith.addf %121, %122 : vector<8x64xf32>
    %124 = arith.mulf %123, %116 : vector<8x64xf32>
    %cst_57 = arith.constant -0.284496725 : f32
    %125 = vector.broadcast %cst_57 : f32 to vector<8x64xf32>
    %126 = arith.addf %124, %125 : vector<8x64xf32>
    %127 = arith.mulf %126, %116 : vector<8x64xf32>
    %cst_58 = arith.constant 0.254829586 : f32
    %128 = vector.broadcast %cst_58 : f32 to vector<8x64xf32>
    %129 = arith.addf %127, %128 : vector<8x64xf32>
    %130 = arith.mulf %129, %116 : vector<8x64xf32>
    %cst_59 = arith.constant 0.000000e+00 : f32
    %131 = vector.broadcast %cst_59 : f32 to vector<8x64xf32>
    %132 = arith.subf %131, %110 : vector<8x64xf32>
    %133 = arith.mulf %132, %110 : vector<8x64xf32>
    %134 = math.exp %133 : vector<8x64xf32>
    %135 = arith.mulf %130, %134 : vector<8x64xf32>
    %cst_60 = arith.constant 1.000000e+00 : f32
    %136 = vector.broadcast %cst_60 : f32 to vector<8x64xf32>
    %137 = arith.subf %136, %135 : vector<8x64xf32>
    %cst_61 = arith.constant 0.000000e+00 : f32
    %138 = vector.broadcast %cst_61 : f32 to vector<8x64xf32>
    %139 = arith.cmpf oge, %109, %138 : vector<8x64xf32>
    %cst_62 = arith.constant 0.000000e+00 : f32
    %140 = vector.broadcast %cst_62 : f32 to vector<8x64xf32>
    %141 = arith.subf %140, %137 : vector<8x64xf32>
    %142 = arith.select %139, %137, %141 : vector<8x64xi1>, vector<8x64xf32>
    %cst_63 = arith.constant 1.000000e+00 : f32
    %143 = vector.broadcast %cst_63 : f32 to vector<8x64xf32>
    %144 = arith.addf %143, %142 : vector<8x64xf32>
    %145 = arith.mulf %107, %144 : vector<8x64xf32>
    %c0_64 = arith.constant 0 : index
    %c0_65 = arith.constant 0 : index
    %146 = vector.load %arg12[%c0_64, %c0_65] : memref<64x32xf32, #tpu.memory_space<vmem>>, vector<64x32xf32>
    %cst_66 = arith.constant dense<0.000000e+00> : vector<8x32xf32>
    %147 = tpu.matmul %145, %146, %cst_66 {dimension_numbers = #tpu.dot_dimension_numbers<[1], [0], [0], [1], [0, 0, 1, 1], [], []>} : vector<8x64xf32>, vector<64x32xf32>, vector<8x32xf32> -> vector<8x32xf32>
    %c0_67 = arith.constant 0 : index
    %c0_68 = arith.constant 0 : index
    %148 = vector.load %arg13[%c0_67, %c0_68] : memref<1x32xf32, #tpu.memory_space<vmem>>, vector<1x32xf32>
    %149 = vector.broadcast %148 : vector<1x32xf32> to vector<8x32xf32>
    %150 = arith.addf %147, %149 : vector<8x32xf32>
    %151 = arith.addf %76, %150 : vector<8x32xf32>
    %c0_69 = arith.constant 0 : index
    %c0_70 = arith.constant 0 : index
    %c0_71 = arith.constant 0 : index
    %152 = vector.load %arg14[%c0_69, %c0_70, %c0_71] : memref<1x8x32xf32, #tpu.memory_space<vmem>>, vector<1x8x32xf32>
    %153 = vector.shape_cast %152 : vector<1x8x32xf32> to vector<8x32xf32>
    %154 = vector.shape_cast %151 : vector<8x32xf32> to vector<1x8x32xf32>
    tpu.vector_store %arg14[%c0_69, %c0_70, %c0_71], %154 {strides = array<i32>} : memref<1x8x32xf32, #tpu.memory_space<vmem>>, vector<1x8x32xf32>,
    return
  }
  func.func @transform_0(%arg0: i32) -> (i32, i32, i32) {
    %c0_i32 = arith.constant 0 : i32
    %c0_i32_0 = arith.constant 0 : i32
    %c0_i32_1 = arith.constant 0 : i32
    return %arg0, %c0_i32, %c0_i32_0 : i32, i32, i32
  }
  func.func @transform_1(%arg0: i32) -> (i32, i32) {
    %c0_i32 = arith.constant 0 : i32
    %c0_i32_0 = arith.constant 0 : i32
    %c0_i32_1 = arith.constant 0 : i32
    return %c0_i32, %c0_i32_0 : i32, i32
  }
  func.func @transform_2(%arg0: i32) -> (i32, i32) {
    %c0_i32 = arith.constant 0 : i32
    %c0_i32_0 = arith.constant 0 : i32
    %c0_i32_1 = arith.constant 0 : i32
    return %c0_i32, %c0_i32_0 : i32, i32
  }
  func.func @transform_3(%arg0: i32) -> (i32, i32, i32) {
    %c0_i32 = arith.constant 0 : i32
    %c0_i32_0 = arith.constant 0 : i32
    %c0_i32_1 = arith.constant 0 : i32
    %c0_i32_2 = arith.constant 0 : i32
    return %c0_i32, %c0_i32_0, %c0_i32_1 : i32, i32, i32
  }
  func.func @transform_4(%arg0: i32) -> (i32, i32, i32) {
    %c0_i32 = arith.constant 0 : i32
    %c0_i32_0 = arith.constant 0 : i32
    %c0_i32_1 = arith.constant 0 : i32
    %c0_i32_2 = arith.constant 0 : i32
    return %c0_i32, %c0_i32_0, %c0_i32_1 : i32, i32, i32
  }
  func.func @transform_5(%arg0: i32) -> (i32, i32, i32) {
    %c0_i32 = arith.constant 0 : i32
    %c0_i32_0 = arith.constant 0 : i32
    %c0_i32_1 = arith.constant 0 : i32
    %c0_i32_2 = arith.constant 0 : i32
    return %c0_i32, %c0_i32_0, %c0_i32_1 : i32, i32, i32
  }
  func.func @transform_6(%arg0: i32) -> (i32, i32) {
    %c0_i32 = arith.constant 0 : i32
    %c0_i32_0 = arith.constant 0 : i32
    %c0_i32_1 = arith.constant 0 : i32
    return %c0_i32, %c0_i32_0 : i32, i32
  }
  func.func @transform_7(%arg0: i32) -> (i32, i32) {
    %c0_i32 = arith.constant 0 : i32
    %c0_i32_0 = arith.constant 0 : i32
    %c0_i32_1 = arith.constant 0 : i32
    return %c0_i32, %c0_i32_0 : i32, i32
  }
  func.func @transform_8(%arg0: i32) -> (i32, i32) {
    %c0_i32 = arith.constant 0 : i32
    %c0_i32_0 = arith.constant 0 : i32
    %c0_i32_1 = arith.constant 0 : i32
    return %c0_i32, %c0_i32_0 : i32, i32
  }
  func.func @transform_9(%arg0: i32) -> (i32, i32) {
    %c0_i32 = arith.constant 0 : i32
    %c0_i32_0 = arith.constant 0 : i32
    %c0_i32_1 = arith.constant 0 : i32
    return %c0_i32, %c0_i32_0 : i32, i32
  }
  func.func @transform_10(%arg0: i32) -> (i32, i32) {
    %c0_i32 = arith.constant 0 : i32
    %c0_i32_0 = arith.constant 0 : i32
    %c0_i32_1 = arith.constant 0 : i32
    return %c0_i32, %c0_i32_0 : i32, i32
  }
  func.func @transform_11(%arg0: i32) -> (i32, i32) {
    %c0_i32 = arith.constant 0 : i32
    %c0_i32_0 = arith.constant 0 : i32
    %c0_i32_1 = arith.constant 0 : i32
    return %c0_i32, %c0_i32_0 : i32, i32
  }
  func.func @transform_12(%arg0: i32) -> (i32, i32) {
    %c0_i32 = arith.constant 0 : i32
    %c0_i32_0 = arith.constant 0 : i32
    %c0_i32_1 = arith.constant 0 : i32
    return %c0_i32, %c0_i32_0 : i32, i32
  }
  func.func @transform_13(%arg0: i32) -> (i32, i32, i32) {
    %c0_i32 = arith.constant 0 : i32
    %c0_i32_0 = arith.constant 0 : i32
    %c0_i32_1 = arith.constant 0 : i32
    return %arg0, %c0_i32, %c0_i32_0 : i32, i32, i32
  }
}

</mosaic_0001>

<bundles_post_ra>
// kernel: tpu_custom_call.1
= control target key start
LH: loop header
LB: loop body
LE: loop exit
PB: predicated region body
PF: predicated region fallthrough
CT: control target
= control target key end

     0   :  { %s4000_s0 = inlined_call_operand.vmem [shape: f32[2,8,32], index: 0, kind: input, shape index: {}]   ;;  %s4001_s1 = inlined_call_operand.vmem [shape: f32[1,32], index: 1, kind: input, shape index: {}]   ;;  %s4002_s2 = inlined_call_operand.vmem [shape: f32[1,32], index: 2, kind: input, shape index: {}]   ;;  %s4003_s3 = inlined_call_operand.vmem [shape: f32[12,32,8], index: 3, kind: input, shape index: {}]   ;;  %s4004_s4 = inlined_call_operand.vmem [shape: f32[12,1,8], index: 4, kind: input, shape index: {}]   ;;  %s4005_s5 = inlined_call_operand.vmem [shape: f32[4,8,32], index: 5, kind: input, shape index: {}]   ;;  %s4006_s6 = inlined_call_operand.vmem [shape: f32[1,32], index: 6, kind: input, shape index: {}]   ;;  %s4007_s7 = inlined_call_operand.vmem [shape: f32[1,32], index: 7, kind: input, shape index: {}]   ;;  %s4008_s8 = inlined_call_operand.vmem [shape: f32[1,32], index: 8, kind: input, shape index: {}]   ;;  %s4009_s9 = inlined_call_operand.vmem [shape: f32[32,64], index: 9, kind: input, shape index: {}]   ;;  %s4010_s10 = inlined_call_operand.vmem [shape: f32[1,64], index: 10, kind: input, shape index: {}]   ;;  %s4011_s11 = inlined_call_operand.vmem [shape: f32[64,32], index: 11, kind: input, shape index: {}]   ;;  %s4012_s12 = inlined_call_operand.vmem [shape: f32[1,32], index: 12, kind: input, shape index: {}]   ;;  %s4013_s13 = inlined_call_operand.hbm [shape: f32[2,8,32], index: 13, kind: output, shape index: {}]  }
   0x1   :  { %4015 = sst [smem:[#allocation7_spill]] %s4000_s0 }
   0x2   :  { %18 = vsyncpa [#allocation3], 0 }
   0x3   :  { %20 = vsyncpa [#allocation3 + $0x1], 0  ;;  %s3441_s25 = smov 0   ;;  %s3443_s26 = smov 0  }
   0x4   :  { %s3445_s27 = smov 0   ;;  %s3447_s28 = smov 0  }
   0x5 LB: > { %4016 = sst [smem:[#allocation5_spill]] %s3361_s27  ;;  %s3462_s29 = sadd.s32 4294967295, %s3365_s28   ;;  %s3365_s28 = sphi %s3447_s28, %s4026_s28   ;;  %s3361_s27 = sphi %s3445_s27, %s4025_s27   ;;  %s3357_s26 = sphi %s3443_s26, %s4024_s26   ;;  %s3353_s25 = sphi %s3441_s25, %s4023_s25  }
   0x6   : > { %s2768_s30 = sadd.s32 4294967294, %s3365_s28   ;;  %s3466_s14 = sadd.s32 1, %s3365_s28  }
   0x7   : > { %s311_s15 = sadd.s32 1, %s3361_s27  ;;  %s308_s16 = ssub.s32 %s3365_s28, %s3466_s14 }
   0x8   : > { %p321_p0 = scmp.ne.s32.totalorder %s3361_s27, %s3357_s26  ;;  %p309_p1 = scmp.eq.s32.totalorder %s308_s16, 0 }
   0x9   : > { %p322_p2 = scmp.eq.s32.totalorder %s3462_s29, 1  ;;  %p327_p3 = scmp.ne.s32.totalorder %s3357_s26, %s3353_s25 }
   0xa   : > { %p328_p4 = scmp.eq.s32.totalorder %s2768_s30, 1  ;;  %p2771_p7 = scmp.ge.s32.totalorder %s3365_s28, 1 }
   0xb   : > { %s3477_s17 = scalar_select %p309_p1, %s3361_s27, %s311_s15  }
   0xc   : > { %p3479_p5 = por %p322_p2, %p321_p0  ;;  %p3483_p6 = por %p328_p4, %p327_p3 }
   0xd   : > { %4017 = sst [smem:[#allocation6_spill]] %s3477_s17  ;;  %p389_p8 = scmp.lt.s32.totalorder %s3365_s28, 3 }
   0xf   : > { %p390_p9 = pnand %p2771_p7, %p389_p8 }
  0x10   : > { %p432_p10 = scmp.lt.s32.totalorder (!%p390_p9), %s3462_s29, 1  ;;  %vm439_vm0 = vcmask (!%p390_p9), 261120   ;;  %s4020_s0 = sld [smem:[#allocation7_spill]] (!%p390_p9)  ;;  %v468_v7 = vld [vmem:[%s4003_s3] sm:$0xff] (!%p390_p9)  ;;  %v469_v8 = vld [vmem:[%s4003_s3 + $0x8] sm:$0xff] (!%p390_p9)  ;;  %v3367_v12 = vmov (!%p390_p9), 0.0|0.0  }
  0x11   : > { %393 = sbr.rel (%p390_p9) target bundleno = 2770 (0xad2), region = 72  ;;  %v472_v9 = vld [vmem:[%s4003_s3 + $0x20] sm:$0xff] (!%p390_p9)  ;;  %v3148_v10 = vpack.c.bf16 (!%p390_p9), %v469_v8, %v468_v7  ;;  %v473_v11 = vld [vmem:[%s4003_s3 + $0x28] sm:$0xff] (!%p390_p9)  ;;  %3147 = vmatprep.subr.bf16.mxu0 (!%p390_p9), %v3367_v12  ;;  %3153 = vmatprep.subr.bf16.mxu1 (!%p390_p9), %v3367_v12  ;;  %v470_v14 = vld [vmem:[%s4003_s3 + $0x10] sm:$0xff] (!%p390_p9)  ;;  %vm3368_vm1 = vmmov (!%p390_p9), 0   ;;  %v3369_v20 = vmov (!%p390_p9), 0.0  }
  0x12   : > { %v3154_v13 = vpack.c.bf16 (!%p390_p9), %v473_v11, %v472_v9  ;;  %v471_v15 = vld [vmem:[%s4003_s3 + $0x18] sm:$0xff] (!%p390_p9)  ;;  %v474_v16 = vld [vmem:[%s4003_s3 + $0x30] sm:$0xff] (!%p390_p9)  ;;  %2933 = vmatprep.mubr.msk.f32.mxu0 (!%p390_p9), %vm3368_vm1, %v3369_v20  ;;  %2944 = vmatprep.mubr.msk.f32.mxu1 (!%p390_p9), %vm3368_vm1, %v3369_v20  ;;  %v2774_v25 = vld [vmem:[%s4001_s1] ss:$0 sm:$0xff] (!%p390_p9)  ;;  %vm1443_vm2 = vcmask (!%p390_p9), 64512   ;;  %s429_s22 = sand.u32 (!%p390_p9), 1, %s3357_s26  }
  0x13   : > { %3149 = vmatpush3.bf16.msra.mxu0 (!%p390_p9), %v3148_v10  ;;  %v3151_v17 = vpack.c.bf16 (!%p390_p9), %v471_v15, %v470_v14  ;;  %v475_v18 = vld [vmem:[%s4003_s3 + $0x38] sm:$0xff] (!%p390_p9)  ;;  %v476_v26 = vld [vmem:[%s4003_s3 + $0x40] sm:$0xff] (!%p390_p9)  ;;  %v477_v28 = vld [vmem:[%s4003_s3 + $0x48] sm:$0xff] (!%p390_p9)  ;;  %s2824_s23 = sshll.u32 (!%p390_p9), %s3462_s29, 7 }
  0x14   : > { %3155 = vmatpush3.bf16.msra.mxu1 (!%p390_p9), %v3154_v13  ;;  %3150 = vmatprep.subr.bf16.mxu0 (!%p390_p9), %v3367_v12  ;;  %v3157_v19 = vpack.c.bf16 (!%p390_p9), %v475_v18, %v474_v16  ;;  %v480_v29 = vld [vmem:[%s4003_s3 + $0x60] sm:$0xff] (!%p390_p9)  ;;  %v481_v30 = vld [vmem:[%s4003_s3 + $0x68] sm:$0xff] (!%p390_p9)  ;;  %v3160_v33 = vpack.c.bf16 (!%p390_p9), %v477_v28, %v476_v26  ;;  %v478_v35 = vld [vmem:[%s4003_s3 + $0x50] sm:$0xff] (!%p390_p9) }
  0x15   : > { %3156 = vmatprep.subr.bf16.mxu1 (!%p390_p9), %v3367_v12  ;;  %v2775_v31 = vld [vmem:[%s4002_s2] ss:$0 sm:$0xff] (!%p390_p9)  ;;  %v3166_v34 = vpack.c.bf16 (!%p390_p9), %v481_v30, %v480_v29  ;;  %v479_v37 = vld [vmem:[%s4003_s3 + $0x58] sm:$0xff] (!%p390_p9)  ;;  %v482_v38 = vld [vmem:[%s4003_s3 + $0x70] sm:$0xff] (!%p390_p9) }
  0x16   : > { %v483_v39 = vld [vmem:[%s4003_s3 + $0x78] sm:$0xff] (!%p390_p9)  ;;  %v3163_v40 = vpack.c.bf16 (!%p390_p9), %v479_v37, %v478_v35  ;;  %v484_v42 = vld [vmem:[%s4003_s3 + $0x80] sm:$0xff] (!%p390_p9)  ;;  %v485_v43 = vld [vmem:[%s4003_s3 + $0x88] sm:$0xff] (!%p390_p9) }
  0x17   : > { %3152 = vmatpush3.bf16.msra.mxu0 (!%p390_p9), %v3151_v17  ;;  %v3169_v41 = vpack.c.bf16 (!%p390_p9), %v483_v39, %v482_v38  ;;  %v488_v44 = vld [vmem:[%s4003_s3 + $0xa0] sm:$0xff] (!%p390_p9)  ;;  %v489_v45 = vld [vmem:[%s4003_s3 + $0xa8] sm:$0xff] (!%p390_p9)  ;;  %v3172_v46 = vpack.c.bf16 (!%p390_p9), %v485_v43, %v484_v42  ;;  %v486_v48 = vld [vmem:[%s4003_s3 + $0x90] sm:$0xff] (!%p390_p9) }
  0x18   : > { %s433_s20 = scalar_select %p432_p10, %s3462_s29, 1  ;;  %3158 = vmatpush3.bf16.msra.mxu1 %v3157_v19  ;;  %3159 = vmatprep.subr.bf16.mxu0 %v3367_v12  ;;  %v3178_v47 = vpack.c.bf16 %v489_v45, %v488_v44  ;;  %v487_v49 = vld [vmem:[%s4003_s3 + $0x98] sm:$0xff]  ;;  %v490_v50 = vld [vmem:[%s4003_s3 + $0xb0] sm:$0xff]  ;;  %v492_v54 = vld [vmem:[%s4003_s3 + $0xc0] sm:$0xff] }
  0x19   : > { %3165 = vmatprep.subr.bf16.mxu1 %v3367_v12  ;;  %v491_v51 = vld [vmem:[%s4003_s3 + $0xb8] sm:$0xff]  ;;  %v3175_v52 = vpack.c.bf16 %v487_v49, %v486_v48  ;;  %v493_v55 = vld [vmem:[%s4003_s3 + $0xc8] sm:$0xff]  ;;  %v496_v56 = vld [vmem:[%s4003_s3 + $0xe0] sm:$0xff] }
  0x1a   : > { %s2773_s21 = sshll.u32 %s433_s20, 3  ;;  %v3181_v53 = vpack.c.bf16 %v491_v51, %v490_v50  ;;  %v497_v57 = vld [vmem:[%s4003_s3 + $0xe8] sm:$0xff]  ;;  %v3184_v58 = vpack.c.bf16 %v493_v55, %v492_v54  ;;  %v494_v60 = vld [vmem:[%s4003_s3 + $0xd0] sm:$0xff]  ;;  %v495_v61 = vld [vmem:[%s4003_s3 + $0xd8] sm:$0xff]  ;;  %s3957_s20 = scalar_lea.hbm %s4013_s13, %s2824_s23 }
  0x1b   : > { %s435_s24 = scalar_lea.vmem %s4020_s0, %s2773_s21  ;;  %v3190_v59 = vpack.c.bf16 %v497_v57, %v496_v56  ;;  %v498_v62 = vld [vmem:[%s4003_s3 + $0xf0] sm:$0xff]  ;;  %v499_v63 = vld [vmem:[%s4003_s3 + $0xf8] sm:$0xff]  ;;  %v508_v16 = vld [vmem:[%s4003_s3 + $0x140] sm:$0xff]  ;;  %s2772_s0 = sshll.u32 %s429_s22, 3 }
  0x1c   : > { %v3494_v0 = vld [vmem:[%s435_s24] sm:$0xff]  ;;  %v502_v9 = vld [vmem:[%s4003_s3 + $0x110] sm:$0xff]  ;;  %v503_v10 = vld [vmem:[%s4003_s3 + $0x118] sm:$0xff]  ;;  %s431_s24 = scalar_lea.vmem [#allocation2], %s2772_s0  ;;  %s2696_s21 = scalar_lea.sflag [#allocation3], %s429_s22 }
  0x1d   : > { %v440_v1 = vsel %vm439_vm0, %v3494_v0, 0.0  ;;  %v506_v11 = vld [vmem:[%s4003_s3 + $0x130] sm:$0xff]  ;;  %v507_v13 = vld [vmem:[%s4003_s3 + $0x138] sm:$0xff]  ;;  %v3199_v14 = vpack.c.bf16 %v503_v10, %v502_v9  ;;  %v509_v17 = vld [vmem:[%s4003_s3 + $0x148] sm:$0xff]  ;;  %s2709_s30 = sshll.u32 %s431_s24, 4  ;;  %s3370_s0 = smov [#allocation2]   ;;  %s3959_s30 = int_to_ptr.vmem [resolvable:$true] %s2709_s30 }
  0x1e   : > { %441 = vadd.xlane.f32.xlu0 %v440_v1  ;;  %v3187_v1 = vpack.c.bf16 %v495_v61, %v494_v60  ;;  %v3205_v15 = vpack.c.bf16 %v507_v13, %v506_v11  ;;  %v512_v18 = vld [vmem:[%s4003_s3 + $0x160] sm:$0xff]  ;;  %v513_v19 = vld [vmem:[%s4003_s3 + $0x168] sm:$0xff]  ;;  %v515_v26 = vld [vmem:[%s4003_s3 + $0x178] sm:$0xff]  ;;  %s3303_s29 = scalar_lea.vmem %s3959_s30, 128  ;;  %s3307_s17 = sshll.u32 %s3370_s0, 4  ;;  %s3308_s17 = int_to_ptr.vmem [resolvable:$false] %s3307_s17 }
  0x1f   : > { %v2780_v38 = vld [vmem:[%s4004_s4 + $0x4] ss:$0 sm:$0xff]  ;;  %v2781_v44 = vld [vmem:[%s4004_s4 + $0x5] ss:$0 sm:$0xff]  ;;  %v2782_v48 = vld [vmem:[%s4004_s4 + $0x6] ss:$0 sm:$0xff]  ;;  %p3304_p11 = scmp.ne.s32.totalorder %s3959_s30, %s3303_s29  ;;  %p3310_p0 = scmp.lt.s32.totalorder %s3959_s30, %s3308_s17 }
  0x20   : > { %v2783_v49 = vld [vmem:[%s4004_s4 + $0x7] ss:$0 sm:$0xff]  ;;  %v2779_v54 = vld [vmem:[%s4004_s4 + $0x3] ss:$0 sm:$0xff]  ;;  %v2784_v61 = vld [vmem:[%s4004_s4 + $0x8] ss:$0 sm:$0xff] }
  0x21   : > { %p3305_p12 = pnand %p3304_p11, %p3479_p5  ;;  %s3309_s27 = scalar_lea.vmem %s3308_s17, 256 }
  0x22   : > { %p3311_p1 = scmp.lt.s32.totalorder %s3309_s27, %s3303_s29 }
  0x23   : > { %p3306_p13 = pneg %p3305_p12 }
  0x24   : > { %p3312_p2 = por %p3311_p1, %p3310_p0 }
  0x26   : > { %p3313_p3 = pnand %p3312_p2, %p3306_p13 }
  0xab   : > { %v442_v2 = vpop.xlane.xlu0 %441 }
  0xac   : > { %v444_v3 = vmul.f32 0.03125, %v442_v2  ;;  %v3193_v2 = vpack.c.bf16 %v499_v63, %v498_v62  ;;  %v2785_v62 = vld [vmem:[%s4004_s4 + $0x9] ss:$0 sm:$0xff] }
  0xae   : > { %v445_v4 = vsub.f32 %v3494_v0, %v444_v3  ;;  %v500_v3 = vld [vmem:[%s4003_s3 + $0x100] sm:$0xff] }
  0xb0   : > { %v446_v5 = vmul.f32 %v445_v4, %v445_v4 }
  0xb2   : > { %v447_v6 = vsel %vm439_vm0, %v446_v5, 0.0  ;;  %v504_v5 = vld [vmem:[%s4003_s3 + $0x120] sm:$0xff] }
  0xb3   : > { %448 = vadd.xlane.f32.xlu0 %v447_v6  ;;  %v505_v6 = vld [vmem:[%s4003_s3 + $0x128] sm:$0xff] }
  0xb4   : > { %v3202_v8 = vpack.c.bf16 %v505_v6, %v504_v5 }
 0x140   : > { %v449_v21 = vpop.xlane.xlu0 %448 }
 0x141   : > { %v450_v22 = vmul.f32 0.03125, %v449_v21  ;;  %v3208_v21 = vpack.c.bf16 %v509_v17, %v508_v16 }
 0x143   : > { %v451_v23 = vadd.f32 1e-05, %v450_v22  ;;  %v3214_v22 = vpack.c.bf16 %v513_v19, %v512_v18 }
 0x145   : > { %3279 = vrsqrt.f32 %v451_v23  ;;  %v510_v23 = vld [vmem:[%s4003_s3 + $0x150] sm:$0xff] }
 0x14f   : > { %v3280_v24 = vpop.eup %3279 }
 0x150   : > { %v453_v27 = vmul.f32 %v3280_v24, %v445_v4  ;;  %v501_v4 = vld [vmem:[%s4003_s3 + $0x108] sm:$0xff]  ;;  %v511_v24 = vld [vmem:[%s4003_s3 + $0x158] sm:$0xff] }
 0x151   : > { %v3196_v7 = vpack.c.bf16 %v501_v4, %v500_v3 }
 0x152   : > { %v460_v32 = vmul.f32 %v2774_v25, %v453_v27  ;;  %v514_v25 = vld [vmem:[%s4003_s3 + $0x170] sm:$0xff]  ;;  %v3211_v27 = vpack.c.bf16 %v511_v24, %v510_v23 }
 0x153   : > { %v3217_v28 = vpack.c.bf16 %v515_v26, %v514_v25 }
 0x154   : > { %v3555_v36 = vadd.f32 %v2775_v31, %v460_v32 }
 0x156   : > { %2934 = vmatmul.mubr.msk.f32.vlgmr.msra.gmra.mrb[0].mxu0 %vm439_vm0, %v3555_v36  ;;  %2945 = vmatmul.mubr.msk.f32.vlgmr.msra.gmra.mrb[0].mxu1 %vm439_vm0, %v3555_v36 }
 0x157   : > { %3161 = vmatpush3.bf16.msra.mxu0 %v3160_v33  ;;  %3167 = vmatpush3.bf16.msra.mxu1 %v3166_v34 }
 0x158   : > { %3162 = vmatprep.subr.bf16.mxu0 %v3367_v12  ;;  %3168 = vmatprep.subr.bf16.mxu1 %v3367_v12 }
 0x159   : > { %2955 = vmatprep.mubr.msk.f32.mxu0 %vm3368_vm1, %v3369_v20  ;;  %2966 = vmatprep.mubr.msk.f32.mxu1 %vm3368_vm1, %v3369_v20 }
 0x15b   : > { %3164 = vmatpush3.bf16.msra.mxu0 %v3163_v40  ;;  %3170 = vmatpush3.bf16.msra.mxu1 %v3169_v41  ;;  %v2776_v40 = vld [vmem:[%s4004_s4] ss:$0 sm:$0xff] }
 0x15c   : > { %3171 = vmatprep.subr.bf16.mxu0 %v3367_v12  ;;  %3177 = vmatprep.subr.bf16.mxu1 %v3367_v12 }
 0x15e   : > { %2956 = vmatmul.mubr.msk.f32.vlgmr.msra.gmra.mrb[2].mxu0 %vm439_vm0, %v3555_v36  ;;  %2967 = vmatmul.mubr.msk.f32.vlgmr.msra.gmra.mrb[2].mxu1 %vm439_vm0, %v3555_v36 }
 0x15f   : > { %3173 = vmatpush3.bf16.msra.mxu0 %v3172_v46  ;;  %3179 = vmatpush3.bf16.msra.mxu1 %v3178_v47  ;;  %v2777_v46 = vld [vmem:[%s4004_s4 + $0x1] ss:$0 sm:$0xff] }
 0x160   : > { %3174 = vmatprep.subr.bf16.mxu0 %v3367_v12  ;;  %3180 = vmatprep.subr.bf16.mxu1 %v3367_v12 }
 0x161   : > { %2977 = vmatprep.mubr.msk.f32.mxu0 %vm3368_vm1, %v3369_v20  ;;  %2988 = vmatprep.mubr.msk.f32.mxu1 %vm3368_vm1, %v3369_v20 }
 0x163   : > { %3176 = vmatpush3.bf16.msra.mxu0 %v3175_v52  ;;  %3182 = vmatpush3.bf16.msra.mxu1 %v3181_v53  ;;  %v2778_v53 = vld [vmem:[%s4004_s4 + $0x2] ss:$0 sm:$0xff] }
 0x164   : > { %3183 = vmatprep.subr.bf16.mxu0 %v3367_v12  ;;  %3189 = vmatprep.subr.bf16.mxu1 %v3367_v12 }
 0x166   : > { %2978 = vmatmul.mubr.msk.f32.vlgmr.msra.gmra.mrb[4].mxu0 %vm439_vm0, %v3555_v36  ;;  %2989 = vmatmul.mubr.msk.f32.vlgmr.msra.gmra.mrb[4].mxu1 %vm439_vm0, %v3555_v36 }
 0x167   : > { %3185 = vmatpush3.bf16.msra.mxu0 %v3184_v58  ;;  %3191 = vmatpush3.bf16.msra.mxu1 %v3190_v59 }
 0x168   : > { %3186 = vmatprep.subr.bf16.mxu0 %v3367_v12  ;;  %3192 = vmatprep.subr.bf16.mxu1 %v3367_v12 }
 0x169   : > { %2999 = vmatprep.mubr.msk.f32.mxu0 %vm3368_vm1, %v3369_v20  ;;  %3010 = vmatprep.mubr.msk.f32.mxu1 %vm3368_vm1, %v3369_v20 }
 0x16b   : > { %3188 = vmatpush3.bf16.msra.mxu0 %v3187_v1  ;;  %3194 = vmatpush3.bf16.msra.mxu1 %v3193_v2 }
 0x16c   : > { %3195 = vmatprep.subr.bf16.mxu0 %v3367_v12  ;;  %3201 = vmatprep.subr.bf16.mxu1 %v3367_v12 }
 0x16e   : > { %3000 = vmatmul.mubr.msk.f32.vlgmr.msra.gmra.mrb[6].mxu0 %vm439_vm0, %v3555_v36  ;;  %3011 = vmatmul.mubr.msk.f32.vlgmr.msra.gmra.mrb[6].mxu1 %vm439_vm0, %v3555_v36 }
 0x16f   : > { %3197 = vmatpush3.bf16.msra.mxu0 %v3196_v7  ;;  %3203 = vmatpush3.bf16.msra.mxu1 %v3202_v8 }
 0x170   : > { %3198 = vmatprep.subr.bf16.mxu0 %v3367_v12  ;;  %3204 = vmatprep.subr.bf16.mxu1 %v3367_v12 }
 0x171   : > { %3021 = vmatprep.mubr.msk.f32.mxu0 %vm3368_vm1, %v3369_v20  ;;  %3032 = vmatprep.mubr.msk.f32.mxu1 %vm3368_vm1, %v3369_v20 }
 0x173   : > { %3200 = vmatpush3.bf16.msra.mxu0 %v3199_v14  ;;  %3206 = vmatpush3.bf16.msra.mxu1 %v3205_v15 }
 0x174   : > { %3207 = vmatprep.subr.bf16.mxu0 %v3367_v12  ;;  %3213 = vmatprep.subr.bf16.mxu1 %v3367_v12 }
 0x176   : > { %3022 = vmatmul.mubr.msk.f32.vlgmr.msra.gmra.mrb[8].mxu0 %vm439_vm0, %v3555_v36  ;;  %3033 = vmatmul.mubr.msk.f32.vlgmr.msra.gmra.mrb[8].mxu1 %vm439_vm0, %v3555_v36 }
 0x177   : > { %3209 = vmatpush3.bf16.msra.mxu0 %v3208_v21  ;;  %3215 = vmatpush3.bf16.msra.mxu1 %v3214_v22 }
 0x178   : > { %3210 = vmatprep.subr.bf16.mxu0 %v3367_v12  ;;  %3216 = vmatprep.subr.bf16.mxu1 %v3367_v12 }
 0x179   : > { %3043 = vmatprep.mubr.msk.f32.mxu0 %vm3368_vm1, %v3369_v20  ;;  %3054 = vmatprep.mubr.msk.f32.mxu1 %vm3368_vm1, %v3369_v20 }
 0x17b   : > { %3212 = vmatpush3.bf16.msra.mxu0 %v3211_v27  ;;  %3218 = vmatpush3.bf16.msra.mxu1 %v3217_v28 }
 0x17c   : > { %3057 = vmatprep.subr.mxu0 %v3369_v20  ;;  %3072 = vmatprep.subr.mxu1 %v3369_v20 }
 0x17e   : > { %3044 = vmatmul.mubr.msk.f32.vlgmr.msra.gmra.mrb[10].mxu0 %vm439_vm0, %v3555_v36  ;;  %3055 = vmatmul.mubr.msk.f32.vlgmr.msra.gmra.mrb[10].mxu1 %vm439_vm0, %v3555_v36 }
 0x17f   : > { %3059 = vmatprep.mubr.msk.f32.mxu0 %vm3368_vm1, %v3369_v20  ;;  %3074 = vmatprep.mubr.msk.f32.mxu1 %vm3368_vm1, %v3369_v20 }
 0x229   : > { %v669_v29 = vpop.f32.mrb[0].mxu0  ;;  %v739_v30 = vpop.f32.mrb[0].mxu1 }
 0x22a   : > { %v2935_v31 = vpop.f32.mrb[1].mxu0  ;;  %v2946_v32 = vpop.f32.mrb[1].mxu1  ;;  %v670_v45 = vadd.f32 %v2776_v40, %v669_v29  ;;  %v740_v50 = vadd.f32 %v2777_v46, %v739_v30 }
 0x231   : > { %v809_v33 = vpop.f32.mrb[2].mxu0  ;;  %v879_v34 = vpop.f32.mrb[2].mxu1 }
 0x232   : > { %v2957_v35 = vpop.f32.mrb[3].mxu0  ;;  %v2968_v37 = vpop.f32.mrb[3].mxu1  ;;  %v810_v59 = vadd.f32 %v2778_v53, %v809_v33  ;;  %v880_v60 = vadd.f32 %v2779_v54, %v879_v34 }
 0x239   : > { %v949_v39 = vpop.f32.mrb[4].mxu0  ;;  %v1019_v36 = vpop.f32.mrb[4].mxu1 }
 0x23a   : > { %v950_v41 = vadd.f32 %v2780_v38, %v949_v39  ;;  %v2979_v42 = vpop.f32.mrb[5].mxu0  ;;  %v2990_v43 = vpop.f32.mrb[5].mxu1  ;;  %v1020_v47 = vadd.f32 %v2781_v44, %v1019_v36 }
 0x23c   : > { %3058 = vmatpush3.xpose.msk.msra.mxu0 %vm1443_vm2, %v950_v41 }
 0x23d   : > { %3062 = vmatprep.subr.mxu0 %v3369_v20 }
 0x23f   : > { %3060 = vmatmul.mubr.msk.f32.vlgmr.msra.gmra.mrb[12].mxu0 %vm1443_vm2, %v670_v45 }
 0x240   : > { %3063 = vmatpush3.xpose.msk.msra.mxu0 %vm1443_vm2, %v1020_v47  ;;  %3064 = vmatprep.mubr.msk.f32.mxu0 %vm3368_vm1, %v3369_v20 }
 0x241   : > { %v1089_v51 = vpop.f32.mrb[6].mxu0  ;;  %v1159_v52 = vpop.f32.mrb[6].mxu1  ;;  %3067 = vmatprep.subr.mxu0 %v3369_v20 }
 0x242   : > { %v1090_v55 = vadd.f32 %v2782_v48, %v1089_v51  ;;  %v1160_v56 = vadd.f32 %v2783_v49, %v1159_v52  ;;  %v3001_v57 = vpop.f32.mrb[7].mxu0  ;;  %v3012_v58 = vpop.f32.mrb[7].mxu1 }
 0x243   : > { %3065 = vmatmul.mubr.msk.f32.vlgmr.msra.gmra.mrb[14].mxu0 %vm1443_vm2, %v740_v50 }
 0x244   : > { %3068 = vmatpush3.xpose.msk.msra.mxu0 %vm1443_vm2, %v1090_v55  ;;  %3073 = vmatpush3.xpose.msk.msra.mxu1 %vm1443_vm2, %v1160_v56 }
 0x245   : > { %3069 = vmatprep.mubr.msk.f32.mxu0 %vm3368_vm1, %v3369_v20  ;;  %3077 = vmatprep.subr.mxu0 %v3369_v20 }
 0x246   : > { %3082 = vmatprep.subr.mxu1 %v3369_v20 }
 0x247   : > { %3070 = vmatmul.mubr.msk.f32.vlgmr.msra.gmra.mrb[16].mxu0 %vm1443_vm2, %v810_v59  ;;  %3075 = vmatmul.mubr.msk.f32.vlgmr.msra.gmra.mrb[12].mxu1 %vm1443_vm2, %v880_v60 }
 0x248   : > { %3079 = vmatprep.mubr.msk.f32.mxu0 %vm3368_vm1, %v3369_v20  ;;  %3084 = vmatprep.mubr.msk.f32.mxu1 %vm3368_vm1, %v3369_v20 }
 0x249   : > { %v1229_v63 = vpop.f32.mrb[8].mxu0  ;;  %v1299_v1 = vpop.f32.mrb[8].mxu1 }
 0x24a   : > { %v1230_v2 = vadd.f32 %v2784_v61, %v1229_v63  ;;  %v1300_v3 = vadd.f32 %v2785_v62, %v1299_v1  ;;  %v3023_v4 = vpop.f32.mrb[9].mxu0  ;;  %v3034_v5 = vpop.f32.mrb[9].mxu1 }
 0x24c   : > { %3078 = vmatpush3.msra.mxu0 %v1230_v2  ;;  %3083 = vmatpush3.msra.mxu1 %v1300_v3 }
 0x24d   : > { %3087 = vmatprep.subr.mxu0 %v3369_v20  ;;  %3092 = vmatprep.subr.mxu1 %v3369_v20 }
 0x251   : > { %v3782_v6 = vpop.f32.mrb[10].mxu0  ;;  %v3784_v7 = vpop.f32.mrb[10].mxu1 }
 0x252   : > { %v3045_v8 = vpop.f32.mrb[11].mxu0  ;;  %v3056_v9 = vpop.f32.mrb[11].mxu1 }
 0x312   : > { %v3786_v10 = vpop.f32.mrb[12].mxu0 }
 0x313   : > { %v3061_v11 = vpop.f32.mrb[13].mxu0  ;;  %v1748_v13 = vsel %vm1443_vm2, %v3786_v10, -inf }
 0x314   : > { %1749 = vmax.xlane.f32.xlu1 %v1748_v13 }
 0x316   : > { %v3790_v14 = vpop.f32.mrb[14].mxu0 }
 0x317   : > { %v3066_v15 = vpop.f32.mrb[15].mxu0  ;;  %v1751_v16 = vsel %vm1443_vm2, %v3790_v14, -inf }
 0x318   : > { %1752 = vmax.xlane.f32.xlu1 %v1751_v16 }
 0x31a   : > { %v3794_v17 = vpop.f32.mrb[16].mxu0  ;;  %v3796_v18 = vpop.f32.mrb[12].mxu1 }
 0x31b   : > { %v3071_v19 = vpop.f32.mrb[17].mxu0  ;;  %v3076_v21 = vpop.f32.mrb[13].mxu1  ;;  %v1757_v22 = vsel %vm1443_vm2, %v3796_v18, -inf  ;;  %v1754_v23 = vsel %vm1443_vm2, %v3794_v17, -inf }
 0x31c   : > { %1758 = vmax.xlane.f32.xlu1 %v1757_v22  ;;  %1755 = vmax.xlane.f32.xlu0 %v1754_v23 }
 0x3a1   : > { %v1750_v24 = vpop.xlane.xlu1 %1749 }
 0x3a2   : > { %vm1760_vm3 = vcmp.ge.f32.partialorder %v3786_v10, %v1750_v24  ;;  %v1824_v25 = vsub.f32 %v3786_v10, %v1750_v24 }
 0x3a3   : > { %v1764_v26 = vsel %vm1760_vm3, -inf, %v3786_v10 }
 0x3a4   : > { %v1768_v27 = vsel %vm1443_vm2, %v1764_v26, -inf  ;;  %v1828_v62 = vmul.f32 1.442695, %v1824_v25 }
 0x3a5   : > { %v1753_v28 = vpop.xlane.xlu1 %1752  ;;  %1769 = vmax.xlane.f32.xlu0 %v1768_v27 }
 0x3a6   : > { %vm1761_vm4 = vcmp.ge.f32.partialorder %v3790_v14, %v1753_v28  ;;  %v1825_v29 = vsub.f32 %v3790_v14, %v1753_v28  ;;  %3281 = vpow2.f32 %v1828_v62 }
 0x3a7   : > { %v1765_v30 = vsel %vm1761_vm4, -inf, %v3790_v14 }
 0x3a8   : > { %v1771_v31 = vsel %vm1443_vm2, %v1765_v30, -inf  ;;  %v1830_v1 = vmul.f32 1.442695, %v1825_v29 }
 0x3a9   : > { %1772 = vmax.xlane.f32.xlu1 %v1771_v31  ;;  %v1759_v32 = vpop.xlane.xlu1 %1758  ;;  %v1756_v33 = vpop.xlane.xlu0 %1755 }
 0x3aa   : > { %vm1763_vm5 = vcmp.ge.f32.partialorder %v3796_v18, %v1759_v32  ;;  %vm1762_vm6 = vcmp.ge.f32.partialorder %v3794_v17, %v1756_v33  ;;  %v1827_v63 = vsub.f32 %v3796_v18, %v1759_v32  ;;  %v1826_v2 = vsub.f32 %v3794_v17, %v1756_v33  ;;  %v2787_v33 = vld [vmem:[%s4004_s4 + $0xb] ss:$0 sm:$0xff] }
 0x3ab   : > { %v1767_v34 = vsel %vm1763_vm5, -inf, %v3796_v18  ;;  %v1766_v35 = vsel %vm1762_vm6, -inf, %v3794_v17  ;;  %3283 = vpow2.f32 %v1830_v1 }
 0x3ac   : > { %v1777_v37 = vsel %vm1443_vm2, %v1767_v34, -inf  ;;  %v1774_v38 = vsel %vm1443_vm2, %v1766_v35, -inf  ;;  %v1834_v3 = vmul.f32 1.442695, %v1827_v63  ;;  %v1832_v4 = vmul.f32 1.442695, %v1826_v2 }
 0x3ad   : > { %1778 = vmax.xlane.f32.xlu1 %v1777_v37  ;;  %1775 = vmax.xlane.f32.xlu0 %v1774_v38  ;;  %v1440_v37 = vadd.f32 %v2787_v33, %v3784_v7  ;;  %v2152_v7 = vld [vmem:[%s4005_s5] sm:$0xff]  ;;  %v2607_v33 = vld [vmem:[%s4011_s11 + $0x18] sm:$0xff] }
 0x3ae   : > { %3285 = vpow2.f32 %v1834_v3 }
 0x3af   : > { %3287 = vpow2.f32 %v1832_v4 }
 0x3b0   : > { %v3282_v8 = vpop.eup %3281 }
 0x3b5   : > { %v3284_v15 = vpop.eup %3283 }
 0x3b8   : > { %v3286_v21 = vpop.eup %3285 }
 0x3b9   : > { %v3288_v24 = vpop.eup %3287 }
 0x432   : > { %v1770_v39 = vpop.xlane.xlu0 %1769 }
 0x433   : > { %vm1780_vm7 = vcmp.ge.f32.partialorder %v1764_v26, %v1770_v39 }
 0x434   : > { %v1784_v36 = vsel %vm1780_vm7, -inf, %v1764_v26 }
 0x435   : > { %v1788_v40 = vsel %vm1443_vm2, %v1784_v36, -inf }
 0x436   : > { %v1773_v41 = vpop.xlane.xlu1 %1772  ;;  %1789 = vmax.xlane.f32.xlu0 %v1788_v40  ;;  %v2153_v40 = vld [vmem:[%s4005_s5 + $0x8] sm:$0xff] }
 0x437   : > { %vm1781_vm8 = vcmp.ge.f32.partialorder %v1765_v30, %v1773_v41  ;;  %v2154_v41 = vld [vmem:[%s4005_s5 + $0x10] sm:$0xff] }
 0x438   : > { %v1785_v42 = vsel %vm1781_vm8, -inf, %v1765_v30 }
 0x439   : > { %v1791_v43 = vsel %vm1443_vm2, %v1785_v42, -inf }
 0x43a   : > { %1792 = vmax.xlane.f32.xlu1 %v1791_v43  ;;  %v1779_v44 = vpop.xlane.xlu1 %1778  ;;  %v1776_v45 = vpop.xlane.xlu0 %1775 }
 0x43b   : > { %vm1783_vm9 = vcmp.ge.f32.partialorder %v1767_v34, %v1779_v44  ;;  %vm1782_vm10 = vcmp.ge.f32.partialorder %v1766_v35, %v1776_v45  ;;  %v2155_v44 = vld [vmem:[%s4005_s5 + $0x18] sm:$0xff] }
 0x43c   : > { %v1787_v46 = vsel %vm1783_vm9, -inf, %v1767_v34  ;;  %v1786_v47 = vsel %vm1782_vm10, -inf, %v1766_v35 }
 0x43d   : > { %v1797_v48 = vsel %vm1443_vm2, %v1787_v46, -inf  ;;  %v1794_v49 = vsel %vm1443_vm2, %v1786_v47, -inf }
 0x43e   : > { %1798 = vmax.xlane.f32.xlu1 %v1797_v48  ;;  %1795 = vmax.xlane.f32.xlu0 %v1794_v49 }
 0x4c3   : > { %v1790_v50 = vpop.xlane.xlu0 %1789 }
 0x4c4   : > { %vm1800_vm11 = vcmp.ge.f32.partialorder %v1784_v36, %v1790_v50 }
 0x4c5   : > { %v1804_v51 = vsel %vm1800_vm11, -inf, %v1784_v36 }
 0x4c6   : > { %v1808_v52 = vsel %vm1443_vm2, %v1804_v51, -inf }
 0x4c7   : > { %v1793_v53 = vpop.xlane.xlu1 %1792  ;;  %1809 = vmax.xlane.f32.xlu0 %v1808_v52 }
 0x4c8   : > { %vm1801_vm12 = vcmp.ge.f32.partialorder %v1785_v42, %v1793_v53 }
 0x4c9   : > { %v1805_v54 = vsel %vm1801_vm12, -inf, %v1785_v42 }
 0x4ca   : > { %v1811_v55 = vsel %vm1443_vm2, %v1805_v54, -inf }
 0x4cb   : > { %1812 = vmax.xlane.f32.xlu1 %v1811_v55  ;;  %v1799_v56 = vpop.xlane.xlu1 %1798  ;;  %v1796_v57 = vpop.xlane.xlu0 %1795 }
 0x4cc   : > { %vm1803_vm13 = vcmp.ge.f32.partialorder %v1787_v46, %v1799_v56  ;;  %vm1802_vm14 = vcmp.ge.f32.partialorder %v1786_v47, %v1796_v57 }
 0x4cd   : > { %v1807_v58 = vsel %vm1803_vm13, -inf, %v1787_v46  ;;  %v1806_v59 = vsel %vm1802_vm14, -inf, %v1786_v47 }
 0x4ce   : > { %v1817_v60 = vsel %vm1443_vm2, %v1807_v58, -inf  ;;  %v1814_v61 = vsel %vm1443_vm2, %v1806_v59, -inf }
 0x4cf   : > { %1818 = vmax.xlane.f32.xlu1 %v1817_v60  ;;  %1815 = vmax.xlane.f32.xlu0 %v1814_v61 }
 0x554   : > { %v1810_v5 = vpop.xlane.xlu0 %1809 }
 0x555   : > { %vm1820_vm15 = vcmp.ge.f32.partialorder %v3786_v10, %v1810_v5 }
 0x556   : > { %v1836_v9 = vsel %vm1820_vm15, %v3282_v8, 0.0 }
 0x557   : > { %v1840_v11 = vsel %vm1443_vm2, %v1836_v9, 0.0 }
 0x558   : > { %v1813_v13 = vpop.xlane.xlu1 %1812  ;;  %1841 = vadd.xlane.f32.xlu0 %v1840_v11 }
 0x559   : > { %vm1821_vm3 = vcmp.ge.f32.partialorder %v3790_v14, %v1813_v13 }
 0x55a   : > { %v1837_v16 = vsel %vm1821_vm3, %v3284_v15, 0.0 }
 0x55b   : > { %v1843_v19 = vsel %vm1443_vm2, %v1837_v16, 0.0 }
 0x55c   : > { %1844 = vadd.xlane.f32.xlu1 %v1843_v19  ;;  %v1819_v22 = vpop.xlane.xlu1 %1818  ;;  %v1816_v23 = vpop.xlane.xlu0 %1815 }
 0x55d   : > { %vm1823_vm4 = vcmp.ge.f32.partialorder %v3796_v18, %v1819_v22  ;;  %vm1822_vm5 = vcmp.ge.f32.partialorder %v3794_v17, %v1816_v23  ;;  %v2786_v18 = vld [vmem:[%s4004_s4 + $0xa] ss:$0 sm:$0xff]  ;;  %v2496_v22 = vld [vmem:[%s4009_s9 + $0x18] sm:$0xff] }
 0x55e   : > { %v1839_v10 = vsel %vm1823_vm4, %v3286_v21, 0.0  ;;  %v1838_v25 = vsel %vm1822_vm5, %v3288_v24, 0.0  ;;  %v1370_v32 = vadd.f32 %v2786_v18, %v3782_v6  ;;  %v2495_v21 = vld [vmem:[%s4009_s9 + $0x10] sm:$0xff]  ;;  %v2604_v18 = vld [vmem:[%s4011_s11] sm:$0xff] }
 0x55f   : > { %v1849_v26 = vsel %vm1443_vm2, %v1839_v10, 0.0  ;;  %v1846_v27 = vsel %vm1443_vm2, %v1838_v25, 0.0  ;;  %v3223_v23 = vpack.c.bf16 %v2496_v22, %v2495_v21 }
 0x560   : > { %1850 = vadd.xlane.f32.xlu1 %v1849_v26  ;;  %1847 = vadd.xlane.f32.xlu0 %v1846_v27  ;;  %v2817_v27 = vld [vmem:[%s4007_s7] ss:$0 sm:$0xff] }
 0x5e5   : > { %v1842_v14 = vpop.xlane.xlu0 %1841 }
 0x5e6   : > { %3289 = vrcp.f32 %v1842_v14 }
 0x5e9   : > { %v1845_v28 = vpop.xlane.xlu1 %1844 }
 0x5ea   : > { %3291 = vrcp.f32 %v1845_v28  ;;  %v2818_v28 = vld [vmem:[%s4008_s8] ss:$0 sm:$0xff] }
 0x5ed   : > { %v1851_v29 = vpop.xlane.xlu1 %1850  ;;  %v1848_v30 = vpop.xlane.xlu0 %1847 }
 0x5ee   : > { %3293 = vrcp.f32 %v1851_v29 }
 0x5ef   : > { %3295 = vrcp.f32 %v1848_v30 }
 0x5f0   : > { %v3290_v17 = vpop.eup %3289 }
 0x5f1   : > { %v1856_v31 = vmul.f32 %v3290_v17, %v1836_v9  ;;  %v2605_v17 = vld [vmem:[%s4011_s11 + $0x8] sm:$0xff] }
 0x5f3   : > { %3080 = vmatmul.mubr.msk.f32.vlgmr.msra.gmra.mrb[18].mxu0 %vm1443_vm2, %v1856_v31  ;;  %v3226_v31 = vpack.c.bf16 %v2605_v17, %v2604_v18 }
 0x5f4   : > { %v3292_v34 = vpop.eup %3291  ;;  %3088 = vmatpush3.msra.mxu0 %v1370_v32  ;;  %3089 = vmatprep.mubr.msk.f32.mxu0 %vm3368_vm1, %v3369_v20  ;;  %v2606_v32 = vld [vmem:[%s4011_s11 + $0x10] sm:$0xff] }
 0x5f5   : > { %v1857_v35 = vmul.f32 %v3292_v34, %v1837_v16  ;;  %3097 = vmatprep.subr.mxu0 %v3369_v20  ;;  %v2493_v16 = vld [vmem:[%s4009_s9] sm:$0xff]  ;;  %v3229_v34 = vpack.c.bf16 %v2607_v33, %v2606_v32 }
 0x5f7   : > { %3085 = vmatmul.mubr.msk.f32.vlgmr.msra.gmra.mrb[14].mxu1 %vm1443_vm2, %v1857_v35  ;;  %v2608_v35 = vld [vmem:[%s4011_s11 + $0x20] sm:$0xff] }
 0x5f8   : > { %v3294_v38 = vpop.eup %3293  ;;  %3093 = vmatpush3.msra.mxu1 %v1440_v37  ;;  %3094 = vmatprep.mubr.msk.f32.mxu1 %vm3368_vm1, %v3369_v20  ;;  %v2609_v37 = vld [vmem:[%s4011_s11 + $0x28] sm:$0xff] }
 0x5f9   : > { %v3296_v6 = vpop.eup %3295  ;;  %v1859_v39 = vmul.f32 %v3294_v38, %v1839_v10  ;;  %3102 = vmatprep.subr.mxu1 %v3369_v20  ;;  %v3232_v38 = vpack.c.bf16 %v2609_v37, %v2608_v35 }
 0x5fa   : > { %v1858_v36 = vmul.f32 %v3296_v6, %v1838_v25  ;;  %v2610_v6 = vld [vmem:[%s4011_s11 + $0x30] sm:$0xff] }
 0x5fb   : > { %3095 = vmatmul.mubr.msk.f32.vlgmr.msra.gmra.mrb[16].mxu1 %vm1443_vm2, %v1859_v39  ;;  %v2611_v39 = vld [vmem:[%s4011_s11 + $0x38] sm:$0xff] }
 0x5fc   : > { %3090 = vmatmul.mubr.msk.f32.vlgmr.msra.gmra.mrb[20].mxu0 %vm1443_vm2, %v1858_v36  ;;  %3104 = vmatprep.mubr.msk.f32.mxu1 %vm3368_vm1, %v3369_v20  ;;  %v3235_v36 = vpack.c.bf16 %v2611_v39, %v2610_v6 }
 0x5fd   : > { %3099 = vmatprep.mubr.msk.f32.mxu0 %vm3368_vm1, %v3369_v20  ;;  %3098 = vmatpush3.msra.mxu0 %v2152_v7  ;;  %v2819_v7 = vld [vmem:[%s4010_s10] ss:$0 sm:$0xff] }
 0x5fe   : > { %3107 = vmatprep.subr.mxu0 %v3369_v20  ;;  %3103 = vmatpush3.msra.mxu1 %v2153_v40 }
 0x5ff   : > { %3112 = vmatprep.subr.mxu1 %v3369_v20 }
 0x6c6   : > { %v1929_v42 = vpop.f32.mrb[18].mxu0 }
 0x6c7   : > { %v3081_v43 = vpop.f32.mrb[19].mxu0  ;;  %3100 = vmatmul.mubr.msk.f32.vlgmr.msra.gmra.mrb[22].mxu0 %vm1443_vm2, %v1929_v42 }
 0x6c8   : > { %3108 = vmatpush3.msra.mxu0 %v2154_v41  ;;  %3109 = vmatprep.mubr.msk.f32.mxu0 %vm3368_vm1, %v3369_v20 }
 0x6c9   : > { %3219 = vmatprep.subr.bf16.mxu0 %v3367_v12 }
 0x6ca   : > { %v2002_v45 = vpop.f32.mrb[14].mxu1 }
 0x6cb   : > { %v3086_v46 = vpop.f32.mrb[15].mxu1  ;;  %3105 = vmatmul.mubr.msk.f32.vlgmr.msra.gmra.mrb[18].mxu1 %vm1443_vm2, %v2002_v45 }
 0x6cc   : > { %3113 = vmatpush3.msra.mxu1 %v2155_v44  ;;  %3114 = vmatprep.mubr.msk.f32.mxu1 %vm3368_vm1, %v3369_v20 }
 0x6cd   : > { %3225 = vmatprep.subr.bf16.mxu1 %v3367_v12 }
 0x6ce   : > { %v2148_v47 = vpop.f32.mrb[16].mxu1 }
 0x6cf   : > { %v2075_v48 = vpop.f32.mrb[20].mxu0  ;;  %v3096_v49 = vpop.f32.mrb[17].mxu1  ;;  %3115 = vmatmul.mubr.msk.f32.vlgmr.msra.gmra.mrb[20].mxu1 %vm1443_vm2, %v2148_v47 }
 0x6d0   : > { %v3091_v50 = vpop.f32.mrb[21].mxu0  ;;  %3110 = vmatmul.mubr.msk.f32.vlgmr.msra.gmra.mrb[24].mxu0 %vm1443_vm2, %v2075_v48  ;;  %3144 = vmatprep.mubr.msk.f32.mxu1 %vm3368_vm1, %v3369_v20  ;;  %vm2619_vm2 = vcmask 523264  }
 0x6d1   : > { %3125 = vmatprep.mubr.msk.f32.mxu0 %vm3368_vm1, %v3369_v20  ;;  %v2816_v20 = vld [vmem:[%s4006_s6] ss:$0 sm:$0xff]  ;;  %3227 = vmatpush3.bf16.msra.mxu1 %v3226_v31 }
 0x6d2   : > { %3228 = vmatprep.subr.bf16.mxu1 %v3367_v12 }
 0x6d5   : > { %3230 = vmatpush3.bf16.msra.mxu1 %v3229_v34 }
 0x6d6   : > { %3231 = vmatprep.subr.bf16.mxu1 %v3367_v12 }
 0x6d9   : > { %3233 = vmatpush3.bf16.msra.mxu1 %v3232_v38 }
 0x6da   : > { %3234 = vmatprep.subr.bf16.mxu1 %v3367_v12 }
 0x6dd   : > { %3236 = vmatpush3.bf16.msra.mxu1 %v3235_v36 }
 0x79a   : > { %v2225_v51 = vpop.f32.mrb[22].mxu0 }
 0x79b   : > { %v3101_v52 = vpop.f32.mrb[23].mxu0  ;;  %v2448_v54 = vsel %vm439_vm0, %v2225_v51, 0.0 }
 0x79e   : > { %v2298_v53 = vpop.f32.mrb[18].mxu1 }
 0x79f   : > { %v2449_v55 = vsel %vm439_vm0, %v2298_v53, 0.0  ;;  %v3106_v56 = vpop.f32.mrb[19].mxu1 }
 0x7a0   : > { %v2450_v57 = vadd.f32 %v2449_v55, %v2448_v54 }
 0x7a2   : > { %v2444_v58 = vpop.f32.mrb[20].mxu1 }
 0x7a3   : > { %v2371_v59 = vpop.f32.mrb[24].mxu0  ;;  %v3116_v60 = vpop.f32.mrb[21].mxu1  ;;  %v2453_v1 = vsel %vm439_vm0, %v2444_v58, 0.0 }
 0x7a4   : > { %v2451_v61 = vsel %vm439_vm0, %v2371_v59, 0.0  ;;  %v3111_v62 = vpop.f32.mrb[25].mxu0 }
 0x7a5   : > { %v2452_v63 = vadd.f32 %v2451_v61, %v2450_v57 }
 0x7a7   : > { %v2454_v2 = vadd.f32 %v2453_v1, %v2452_v63 }
 0x7a9   : > { %v2462_v3 = vadd.f32 %v2816_v20, %v2454_v2 }
 0x7ab   : > { %v3892_v4 = vadd.f32 %v2462_v3, %v3494_v0  ;;  %v2494_v0 = vld [vmem:[%s4009_s9 + $0x8] sm:$0xff]  ;;  %v2821_v3 = vld [vmem:[%s4012_s12] ss:$0 sm:$0xff] }
 0x7ac   : > { %v3220_v19 = vpack.c.bf16 %v2494_v0, %v2493_v16 }
 0x7ad   : > { %v2466_v5 = vsel %vm439_vm0, %v3892_v4, 0.0 }
 0x7ae   : > { %2467 = vadd.xlane.f32.xlu0 %v2466_v5  ;;  %3221 = vmatpush3.bf16.msra.mxu0 %v3220_v19 }
 0x7af   : > { %3222 = vmatprep.subr.bf16.mxu0 %v3367_v12 }
 0x7b2   : > { %3224 = vmatpush3.bf16.msra.mxu0 %v3223_v23 }
 0x83b   : > { %v2468_v8 = vpop.xlane.xlu0 %2467 }
 0x83c   : > { %v2469_v9 = vmul.f32 0.03125, %v2468_v8 }
 0x83e   : > { %v2470_v11 = vsub.f32 %v3892_v4, %v2469_v9 }
 0x840   : > { %v2471_v13 = vmul.f32 %v2470_v11, %v2470_v11 }
 0x842   : > { %v2472_v15 = vsel %vm439_vm0, %v2471_v13, 0.0 }
 0x843   : > { %2473 = vadd.xlane.f32.xlu1 %v2472_v15 }
 0x8d0   : > { %v2474_v24 = vpop.xlane.xlu1 %2473 }
 0x8d1   : > { %v2475_v10 = vmul.f32 0.03125, %v2474_v24 }
 0x8d3   : > { %v2476_v25 = vadd.f32 1e-05, %v2475_v10 }
 0x8d5   : > { %3297 = vrsqrt.f32 %v2476_v25 }
 0x8df   : > { %v3298_v26 = vpop.eup %3297 }
 0x8e0   : > { %v2478_v14 = vmul.f32 %v3298_v26, %v2470_v11 }
 0x8e2   : > { %v2485_v29 = vmul.f32 %v2817_v27, %v2478_v14 }
 0x8e4   : > { %v2492_v30 = vadd.f32 %v2818_v28, %v2485_v29 }
 0x8e6   : > { %3126 = vmatmul.mubr.msk.f32.vlgmr.msra.gmra.mrb[26].mxu0 %vm439_vm0, %v2492_v30 }
 0x9b9   : > { %v2573_v40 = vpop.f32.mrb[26].mxu0 }
 0x9ba   : > { %v2574_v41 = vadd.f32 %v2819_v7, %v2573_v40  ;;  %v3127_v42 = vpop.f32.mrb[27].mxu0 }
 0x9bc   : > { %v2578_v43 = vmul.f32 0.70710677, %v2574_v41  ;;  %v2577_v1 = vmul.f32 0.5, %v2574_v41 }
 0x9be   : > { %v2579_v44 = vand.u32 2147483647, %v2578_v43  ;;  %vm2599_vm1 = vcmp.ge.f32.partialorder %v2578_v43, 0.0 }
 0x9c0   : > { %v2580_v12 = vmul.f32 0.3275911, %v2579_v44  ;;  %v2593_v46 = vsub.f32 0.0, %v2579_v44 }
 0x9c2   : > { %v2581_v45 = vadd.f32 1.0, %v2580_v12  ;;  %v2594_v48 = vmul.f32 %v2593_v46, %v2579_v44 }
 0x9c4   : > { %3299 = vrcp.f32 %v2581_v45  ;;  %v2595_v51 = vmul.f32 1.442695, %v2594_v48 }
 0x9c6   : > { %3301 = vpow2.f32 %v2595_v51 }
 0x9ce   : > { %v3300_v47 = vpop.eup %3299 }
 0x9cf   : > { %v2584_v49 = vmul.f32 1.0614054, %v3300_v47 }
 0x9d0   : > { %v3302_v59 = vpop.eup %3301 }
 0x9d1   : > { %v2585_v50 = vadd.f32 -1.4531521, %v2584_v49 }
 0x9d3   : > { %v2586_v52 = vmul.f32 %v3300_v47, %v2585_v50 }
 0x9d5   : > { %v2587_v53 = vadd.f32 1.4214138, %v2586_v52 }
 0x9d7   : > { %v2588_v54 = vmul.f32 %v3300_v47, %v2587_v53 }
 0x9d9   : > { %v2589_v55 = vadd.f32 -0.28449672, %v2588_v54 }
 0x9db   : > { %v2590_v56 = vmul.f32 %v3300_v47, %v2589_v55 }
 0x9dd   : > { %v2591_v57 = vadd.f32 0.2548296, %v2590_v56 }
 0x9df   : > { %v2592_v58 = vmul.f32 %v3300_v47, %v2591_v57 }
 0x9e1   : > { %v2597_v60 = vmul.f32 %v3302_v59, %v2592_v58 }
 0x9e3   : > { %v2598_v61 = vsub.f32 1.0, %v2597_v60 }
 0x9e5   : > { %v2600_v62 = vsub.f32 0.0, %v2598_v61 }
 0x9e7   : > { %v2601_v63 = vsel %vm2599_vm1, %v2598_v61, %v2600_v62 }
 0x9e8   : > { %v2602_v20 = vadd.f32 1.0, %v2601_v63 }
 0x9ea   : > { %v2603_v2 = vmul.f32 %v2602_v20, %v2577_v1 }
 0x9ec   : > { %3145 = vmatmul.mubr.msk.f32.vlgmr.msra.gmra.mrb[22].mxu1 %vm2619_vm2, %v2603_v2 }
 0xabf   : > { %v2689_v5 = vpop.f32.mrb[22].mxu1 }
 0xac0   : > { %v2690_v8 = vadd.f32 %v2821_v3, %v2689_v5  ;;  %v3146_v9 = vpop.f32.mrb[23].mxu1 }
 0xac2   : > { %v2693_v11 = vadd.f32 %v2690_v8, %v3892_v4 }
 0xac4   : > { %2694 = vst.msk [vmem:[%s431_s24] sm:$0xff] %vm439_vm0, %v2693_v11 }
 0xac5   : > { %3316 = shalt.err (!%p3313_p3)
}
 0xac6   : > { %s3317_s22 = scalar_lea.hbm %s3957_s20, 128  ;;  %s3321_s15 = scalar_lea.hbm %s4013_s13, 256 }
 0xac7   : > { %p3318_p4 = scmp.ne.s32.totalorder %s3957_s20, %s3317_s22  ;;  %p3322_p9 = scmp.lt.u32.totalorder %s3957_s20, %s4013_s13 }
 0xac8   : > { %p3323_p10 = scmp.lt.u32.totalorder %s3321_s15, %s3317_s22  ;;  %p3325_p12 = scmp.lt.u32.totalorder %s3317_s22, %s3957_s20 }
 0xac9   : > { %p3319_p7 = pnand %p3318_p4, %p3479_p5 }
 0xaca   : > { %p3324_p11 = por %p3323_p10, %p3322_p9 }
 0xacb   : > { %p3320_p8 = pneg %p3319_p7 }
 0xacc   : > { %p3326_p13 = por %p3325_p12, %p3324_p11 }
 0xace   : > { %p3327_p0 = pnand %p3326_p13, %p3320_p8 }
 0xad0   : > { %3330 = shalt.err (!%p3327_p0)
}
 0xad1   : > { %3237 = dma.vmem_to_hbm [thread:$0]  (%p3479_p5), %s3959_s30, 128, %s3957_s20, %s2696_s21  }
 0xad2 PF: > { %p3243_p1 = scmp.ge.s32.totalorder %s3365_s28, 2  ;;  %s2721_s29 = sand.u32 1, %s3353_s25  }
 0xad3   : > { %s2722_s17 = scalar_lea.sflag [#allocation3], %s2721_s29 }
 0xad4   : > { %p3240_p2 = pnand %p3243_p1, %p3483_p6 }
 0xad6   : > { %3348 = dma.done.wait (!%p3240_p2), %s2722_s17, 128  }
 0xad7   : > { %3350 = vsyncadd (!%p3240_p2), %s2722_s17, 4294967168  ;;  %s4021_s27 = sld [smem:[#allocation5_spill]]  ;;  %s4022_s22 = sld [smem:[#allocation6_spill]] }
 0xad8   : > { %p23_p3 = scmp.ge.s32.totalorder %s3466_s14, 4   ;;  %s4023_s25 = smov %s3357_s26 }
 0xad9   : > { %s4026_s28 = smov %s3466_s14 }
 0xada   :  { %25 = sbr.rel (!%p23_p3) target bundleno = 5 (0x5), region = 107 }
 0xadd   : > { %s4024_s26 = smov %s4021_s27  ;;  %s4025_s27 = smov %s4022_s22 }
 0xae1   :  { %2727 = vsyncpa [#allocation3], 1 }
 0xae2   :  { %2729 = vsyncpa [#allocation3 + $0x1], 1 }

</bundles_post_ra>
